<compile_context>
chip_gen: v7x
topology: tpu7x:2x2x1
jax: 0.10.0
libtpu: 0.0.40
codegen_flags: <defaults>
</compile_context>

<pallas_src>
import numpy as np

import jax
import jax.numpy as jnp
from jax.experimental import pallas as pl
from jax.experimental.pallas import tpu as pltpu


# Architecture constants (FirstNet on 28x28 single-channel input; fc1 in=256 => 28x28).
_H0 = 28                   # input spatial size
_K = 5                     # conv kernel size
_C1, _C2 = 6, 16           # conv output channels
_H1 = _H0 - _K + 1         # 24 : conv1 output spatial
_P1 = _H1 // 2             # 12 : pool1 output spatial
_H2 = _P1 - _K + 1         # 8  : conv2 output spatial
_P2 = _H2 // 2             # 4  : pool2 output spatial
_FC1, _FC2, _FC3 = 120, 84, 10

_ODD_OFF = 128             # lane offset of the "odd" half in the stacked lane selectors
_FW3_OFF = 128             # row offset of fw3 inside the fw2|fw3 slab (bf16-tile aligned)


def _sel_offsets(batch):
    """Row offsets of the four pool selectors inside the packed selector slab."""
    o_cs1 = 0
    o_cs2 = o_cs1 + _C1 * _H1             # 144
    o_rs1 = o_cs2 + _C2 * _H2             # 272
    o_rs2 = o_rs1 + 2 * batch * _P1       # 272 + 24*B
    rows = o_rs2 + 2 * batch * _P2
    width = max(_ODD_OFF + _C1 * _P1, _ODD_OFF + _C2 * _P2,
                batch * _H1, batch * _H2)
    return o_cs1, o_cs2, o_rs1, o_rs2, rows, width


# ----------------------------------------------------------------------------
# Fused kernel
# ----------------------------------------------------------------------------

def _firstnet_kernel(x_ref, t1_ref, t2_ref, fw1_ref, fw23_ref, sel_ref, bias_ref,
                     o_ref, p1_ref, p2_ref):
    f32, bf16 = jnp.float32, jnp.bfloat16
    B = o_ref.shape[0]

    def mm(a, b):
        # bf16 operands into the MXU, f32 accumulate.
        return jnp.dot(a.astype(bf16), b.astype(bf16), preferred_element_type=f32)

    def sigmoid(z):
        # exp + approximate reciprocal both run on the EUP slot (frees the VPU).
        return pl.reciprocal(1.0 + jnp.exp(-z), approx=True)

    def pool(a, rs, cs, n_rows_out, n_lanes_out):
        # 2x2/stride-2 max-pool on (rows = h*B + b, lanes = ch*W + w):
        #   1 stacked (even ; odd) row-selector matmul  + max of the two row halves,
        #   1 stacked (even | odd) lane-selector matmul + max of the two lane halves.
        # Row halves split on an 8-sublane boundary, lane halves on the 128 boundary.
        r = mm(rs, a)
        rmax = jnp.maximum(r[0:n_rows_out, :], r[n_rows_out:2 * n_rows_out, :])
        l = mm(rmax, cs)
        return jnp.maximum(l[:, 0:n_lanes_out],
                           l[:, _ODD_OFF:_ODD_OFF + n_lanes_out])

    # ---- static views of the packed operand slabs -------------------------------
    o_cs1, o_cs2, o_rs1, o_rs2, _, _ = _sel_offsets(B)
    cs1 = sel_ref[o_cs1:o_cs1 + _C1 * _H1, 0:_ODD_OFF + _C1 * _P1]   # (144, 200)
    cs2 = sel_ref[o_cs2:o_cs2 + _C2 * _H2, 0:_ODD_OFF + _C2 * _P2]   # (128, 192)
    rs1 = sel_ref[o_rs1:o_rs1 + 2 * B * _P1, 0:B * _H1]              # (48, 48)
    rs2 = sel_ref[o_rs2:o_rs2 + 2 * B * _P2, 0:B * _H2]              # (16, 16)
    b1 = bias_ref[0:1, 0:_C1 * _H1]                                  # (1, 144)
    b2 = bias_ref[1:2, 0:_C2 * _H2]                                  # (1, 128)
    fb1 = bias_ref[2:3, 0:_FC1]
    fb2 = bias_ref[3:4, 0:_FC2]
    fb3 = bias_ref[4:5, 0:_FC3]
    fw2 = fw23_ref[0:_FC1, 0:_FC2]                                   # (120, 84)
    fw3 = fw23_ref[_FW3_OFF:_FW3_OFF + _FC2, 0:_FC3]                 # (84, 10)

    # ---- conv1 (1->6, 5x5, valid) + sigmoid: banded matmuls over kh --------------
    # rows: oh*B + b, lanes: oc*24 + ow
    a1 = mm(x_ref[0:B * _H1, :], t1_ref[0])
    for kh in range(1, _K):
        a1 = a1 + mm(x_ref[kh * B:(kh + _H1) * B, :], t1_ref[kh])
    a1 = sigmoid(a1 + b1)                                            # (B*24, 144)

    # ---- maxpool1 ----  rows: p*B + b, lanes: ic*12 + w
    p1_ref[...] = pool(a1, rs1, cs1, B * _P1, _C1 * _P1)             # (B*12, 72)

    # ---- conv2 (6->16, 5x5, valid) + sigmoid -------------------------------------
    a2 = mm(p1_ref[0:B * _H2, :], t2_ref[0])
    for kh in range(1, _K):
        a2 = a2 + mm(p1_ref[kh * B:(kh + _H2) * B, :], t2_ref[kh])
    a2 = sigmoid(a2 + b2)                                            # (B*8, 128)

    # ---- maxpool2 ----  rows: oh*B + b, lanes: oc*4 + w
    p2_ref[...] = pool(a2, rs2, cs2, B * _P2, _C2 * _P2)             # (B*4, 64)

    # ---- fc stack (fc1 blocked over oh; fw1 rows pre-permuted in the wrapper) ----
    h = mm(p2_ref[0:B, :], fw1_ref[0])
    for oh in range(1, _P2):
        h = h + mm(p2_ref[oh * B:(oh + 1) * B, :], fw1_ref[oh])
    h = sigmoid(h + fb1)                                             # (B, 120)
    h = sigmoid(mm(h, fw2) + fb2)                                    # (B, 84)
    z = mm(h, fw3) + fb3                                             # (B, 10)

    # ---- log_softmax(axis=-1), numerically stable --------------------------------
    m = jnp.max(z, axis=-1, keepdims=True)
    lse = jnp.log(jnp.sum(jnp.exp(z - m), axis=-1, keepdims=True))
    o_ref[...] = (z - m - lse).astype(o_ref.dtype)


# ----------------------------------------------------------------------------
# One-time weight repacking (keep the result; it is OFF the per-call path)
# ----------------------------------------------------------------------------

def _band(k, n_in, n_out):
    # band[q, i, w] = 1.0 where i == w + q
    q = np.arange(k)[:, None, None]
    i = np.arange(n_in)[None, :, None]
    w = np.arange(n_out)[None, None, :]
    return (i == w + q).astype(np.float32)


def _row_pool_selector(batch, h_in):
    # Stacked (even ; odd): out row p*B+b <- in rows (2p)*B+b (top) / (2p+1)*B+b (bottom).
    p_out = h_in // 2
    s = np.zeros((2 * batch * p_out, batch * h_in), np.float32)
    for p in range(p_out):
        for b in range(batch):
            s[p * batch + b, (2 * p) * batch + b] = 1.0
            s[batch * p_out + p * batch + b, (2 * p + 1) * batch + b] = 1.0
    return s


def _lane_pool_selector(ch, w_in):
    # Stacked (even | odd): out lane c*w_out+p <- in lanes c*w_in+2p / c*w_in+2p+1;
    # the odd half starts at lane _ODD_OFF so both halves slice on a 128 boundary.
    w_out = w_in // 2
    assert ch * w_out <= _ODD_OFF
    s = np.zeros((ch * w_in, _ODD_OFF + ch * w_out), np.float32)
    for c in range(ch):
        for p in range(w_out):
            s[c * w_in + 2 * p, c * w_out + p] = 1.0
            s[c * w_in + 2 * p + 1, _ODD_OFF + c * w_out + p] = 1.0
    return s


def pack_params(p, batch):
    """Repack PyTorch-layout weights into the kernel's banded / blocked bf16 slabs."""
    assert _H1 % 2 == 0 and _H2 % 2 == 0, "pool-as-matmul needs even conv output widths"
    bf16, f32 = jnp.bfloat16, np.float32

    cw1 = np.asarray(p["cw1"], f32)                                   # (6, 1, 5, 5)
    cw2 = np.asarray(p["cw2"], f32)                                   # (16, 6, 5, 5)
    # conv1: t1[kh, i, oc*24+ow] = cw1[oc, 0, kh, i-ow] inside the band, else 0.
    t1 = np.einsum("okq,qiw->kiow", cw1[:, 0], _band(_K, _H0, _H1))
    t1 = t1.reshape(_K, _H0, _C1 * _H1)                               # (5, 28, 144)
    # conv2: t2[kh, ic*12+i, oc*8+ow] = cw2[oc, ic, kh, i-ow] inside the band, else 0.
    t2 = np.einsum("ockq,qiw->kciow", cw2, _band(_K, _P1, _H2))
    t2 = t2.reshape(_K, _C1 * _P1, _C2 * _H2)                         # (5, 72, 128)

    # fc1: permute rows from PyTorch flatten order (oc*16 + oh*4 + ow) into per-oh
    # blocks whose rows follow the kernel's pool2 lane order (oc*4 + ow).
    oh, oc, ow = np.meshgrid(np.arange(_P2), np.arange(_C2), np.arange(_P2),
                             indexing="ij")
    perm = (oc * (_P2 * _P2) + oh * _P2 + ow).reshape(-1)             # length 256
    fw1 = np.asarray(p["fw1"], f32)[perm].reshape(_P2, _C2 * _P2, _FC1)  # (4, 64, 120)

    # fc2 | fc3 slab (fw3 at a bf16-tile-aligned row offset).
    fw23 = np.zeros((_FW3_OFF + _FC2, _FC2), f32)                     # (212, 84)
    fw23[0:_FC1, 0:_FC2] = np.asarray(p["fw2"], f32)
    fw23[_FW3_OFF:_FW3_OFF + _FC2, 0:_FC3] = np.asarray(p["fw3"], f32)

    # Pool selector slab (exact 0/1 values, representable in bf16).
    o_cs1, o_cs2, o_rs1, o_rs2, rows, width = _sel_offsets(batch)
    sel = np.zeros((rows, width), f32)
    for off, block in ((o_cs1, _lane_pool_selector(_C1, _H1)),
                       (o_cs2, _lane_pool_selector(_C2, _H2)),
                       (o_rs1, _row_pool_selector(batch, _H1)),
                       (o_rs2, _row_pool_selector(batch, _H2))):
        sel[off:off + block.shape[0], 0:block.shape[1]] = block

    # Bias slab (f32; one row per bias, lane layout matching its consumer).
    bias = np.zeros((5, _C1 * _H1), f32)                              # (5, 144)
    bias[0, 0:_C1 * _H1] = np.repeat(np.asarray(p["cb1"], f32), _H1)
    bias[1, 0:_C2 * _H2] = np.repeat(np.asarray(p["cb2"], f32), _H2)
    bias[2, 0:_FC1] = np.asarray(p["fb1"], f32)
    bias[3, 0:_FC2] = np.asarray(p["fb2"], f32)
    bias[4, 0:_FC3] = np.asarray(p["fb3"], f32)

    return (jnp.asarray(t1, bf16), jnp.asarray(t2, bf16), jnp.asarray(fw1, bf16),
            jnp.asarray(fw23, bf16), jnp.asarray(sel, bf16),
            jnp.asarray(bias, jnp.float32))


# ----------------------------------------------------------------------------
# Wrapper
# ----------------------------------------------------------------------------

def _full_spec(shape):
    return pl.BlockSpec(shape, lambda i: (0,) * len(shape))


def firstnet_forward(img_nchw, packed):
    """Fused FirstNet forward: one pallas_call; `packed` comes from pack_params()."""
    B = img_nchw.shape[0]
    assert img_nchw.shape[1:] == (1, _H0, _H0)
    # Interleave batch rows: row h*B + b = img[b, 0, h, :]  (h-major, batch-minor),
    # so every kh-shifted conv slice is one contiguous ref slice inside the kernel.
    x2 = jnp.transpose(img_nchw[:, 0], (1, 0, 2)).reshape(_H0 * B, _H0)
    operands = (x2,) + tuple(packed)
    return pl.pallas_call(
        _firstnet_kernel,
        out_shape=jax.ShapeDtypeStruct((B, _FC3), jnp.float32),
        grid=(1,),
        in_specs=[_full_spec(op.shape) for op in operands],
        out_specs=_full_spec((B, _FC3)),
        scratch_shapes=[
            pltpu.VMEM((B * _P1, _C1 * _P1), jnp.float32),   # pool1 out (B*12, 72)
            pltpu.VMEM((B * _P2, _C2 * _P2), jnp.float32),   # pool2 out (B*4, 64)
        ],
        compiler_params=pltpu.CompilerParams(
            dimension_semantics=("arbitrary",)),
    )(*operands)


# ----------------------------------------------------------------------------
# Pure-JAX reference (for correctness check)
# ----------------------------------------------------------------------------

def reference_forward(img, p):
    def conv(x, w, b):
        y = jax.lax.conv_general_dilated(
            x, w, window_strides=(1, 1), padding="VALID",
            dimension_numbers=("NCHW", "OIHW", "NCHW"))
        return jax.nn.sigmoid(y + b[None, :, None, None])

    def pool(x):
        return jax.lax.reduce_window(
            x, -jnp.inf, jax.lax.max, (1, 1, 2, 2), (1, 1, 2, 2), "VALID")

    x = pool(conv(img, p["cw1"], p["cb1"]))
    x = pool(conv(x, p["cw2"], p["cb2"]))
    f = x.reshape(x.shape[0], -1)
    h = jax.nn.sigmoid(f @ p["fw1"] + p["fb1"])
    h = jax.nn.sigmoid(h @ p["fw2"] + p["fb2"])
    z = h @ p["fw3"] + p["fb3"]
    return jax.nn.log_softmax(z, axis=1)


# ----------------------------------------------------------------------------
# Main
# ----------------------------------------------------------------------------

def init_params(key):
    ks = jax.random.split(key, 11)
    f32 = jnp.float32
    return {
        "cw1": jax.random.normal(ks[0], (6, 1, 5, 5), f32) * 0.2,
        "cb1": jax.random.normal(ks[1], (6,), f32) * 0.1,
        "cw2": jax.random.normal(ks[2], (16, 6, 5, 5), f32) * 0.1,
        "cb2": jax.random.normal(ks[3], (16,), f32) * 0.1,
        "fw1": jax.random.normal(ks[4], (256, 120), f32) * 0.05,
        "fb1": jax.random.normal(ks[5], (120,), f32) * 0.05,
        "fw2": jax.random.normal(ks[6], (120, 84), f32) * 0.05,
        "fb2": jax.random.normal(ks[7], (84,), f32) * 0.05,
        "fw3": jax.random.normal(ks[8], (84, 10), f32) * 0.05,
        "fb3": jax.random.normal(ks[9], (10,), f32) * 0.05,
    }


if __name__ == "__main__":
    key = jax.random.PRNGKey(0)
    pkey, xkey = jax.random.split(key)
    params = init_params(pkey)
    # fc1 in_features = 256 = 16*4*4 implies a 28x28 single-channel input (MNIST-like).
    img = jax.random.normal(xkey, (2, 1, 28, 28), jnp.float32)

    # One-time packing (hoisted out of the per-call serving path).
    packed = pack_params(params, batch=img.shape[0])

    fwd = jax.jit(firstnet_forward)
    out = jax.block_until_ready(fwd(img, packed))
    assert out.shape == (2, 10) and out.dtype == jnp.float32

    ref = jax.block_until_ready(reference_forward(img, params))
    # bf16 MXU operands + approximate-EUP sigmoid reciprocal => small (~1e-2) diffs.
    if not jnp.allclose(out, ref, atol=2e-2, rtol=2e-2):
        max_err = float(jnp.max(jnp.abs(out - ref)))
        raise AssertionError(
            f"Pallas output does not match pure-JAX reference (max abs err {max_err})")

    print("KERNEL_OK")
</pallas_src>

<mosaic_0001>
module attributes {stable_mosaic.version = 11 : i64} {
  func.func @_firstnet_kernel(%arg0: i32, %arg1: memref<56x28xf32, #tpu.memory_space<vmem>>, %arg2: memref<5x28x144xbf16, #tpu.memory_space<vmem>>, %arg3: memref<5x72x128xbf16, #tpu.memory_space<vmem>>, %arg4: memref<4x64x120xbf16, #tpu.memory_space<vmem>>, %arg5: memref<212x84xbf16, #tpu.memory_space<vmem>>, %arg6: memref<336x200xbf16, #tpu.memory_space<vmem>>, %arg7: memref<5x144xf32, #tpu.memory_space<vmem>>, %arg8: memref<2x10xf32, #tpu.memory_space<vmem>>, %arg9: memref<24x72xf32, #tpu.memory_space<vmem>>, %arg10: memref<8x64xf32, #tpu.memory_space<vmem>>) attributes {dimension_semantics = [#tpu.dimension_semantics<arbitrary>], iteration_bounds = array<i64: 1>, scalar_prefetch = 0 : i64, scratch_operands = 2 : i64, tpu.core_type = #tpu.core_type<tc>, window_params = [{pipeline_mode = #tpu.pipeline_mode<synchronous>, transform_indices = @transform_0, window_bounds = array<i64: 56, 28>}, {pipeline_mode = #tpu.pipeline_mode<synchronous>, transform_indices = @transform_1, window_bounds = array<i64: 5, 28, 144>}, {pipeline_mode = #tpu.pipeline_mode<synchronous>, transform_indices = @transform_2, window_bounds = array<i64: 5, 72, 128>}, {pipeline_mode = #tpu.pipeline_mode<synchronous>, transform_indices = @transform_3, window_bounds = array<i64: 4, 64, 120>}, {pipeline_mode = #tpu.pipeline_mode<synchronous>, transform_indices = @transform_4, window_bounds = array<i64: 212, 84>}, {pipeline_mode = #tpu.pipeline_mode<synchronous>, transform_indices = @transform_5, window_bounds = array<i64: 336, 200>}, {pipeline_mode = #tpu.pipeline_mode<synchronous>, transform_indices = @transform_6, window_bounds = array<i64: 5, 144>}, {pipeline_mode = #tpu.pipeline_mode<synchronous>, transform_indices = @transform_7, window_bounds = array<i64: 2, 10>}]} {
    %c0 = arith.constant 0 : index
    %c0_0 = arith.constant 0 : index
    %0 = vector.load %arg6[%c0, %c0_0] : memref<336x200xbf16, #tpu.memory_space<vmem>>, vector<144x200xbf16>
    %c144 = arith.constant 144 : index
    %c0_1 = arith.constant 0 : index
    %1 = vector.load %arg6[%c144, %c0_1] : memref<336x200xbf16, #tpu.memory_space<vmem>>, vector<128x192xbf16>
    %c272 = arith.constant 272 : index
    %c0_2 = arith.constant 0 : index
    %2 = vector.load %arg6[%c272, %c0_2] : memref<336x200xbf16, #tpu.memory_space<vmem>>, vector<48x48xbf16>
    %c320 = arith.constant 320 : index
    %c0_3 = arith.constant 0 : index
    %3 = vector.load %arg6[%c320, %c0_3] : memref<336x200xbf16, #tpu.memory_space<vmem>>, vector<16x16xbf16>
    %c0_4 = arith.constant 0 : index
    %c0_5 = arith.constant 0 : index
    %4 = vector.load %arg7[%c0_4, %c0_5] : memref<5x144xf32, #tpu.memory_space<vmem>>, vector<1x144xf32>
    %c1 = arith.constant 1 : index
    %c0_6 = arith.constant 0 : index
    %5 = vector.load %arg7[%c1, %c0_6] : memref<5x144xf32, #tpu.memory_space<vmem>>, vector<1x128xf32>
    %c2 = arith.constant 2 : index
    %c0_7 = arith.constant 0 : index
    %6 = vector.load %arg7[%c2, %c0_7] : memref<5x144xf32, #tpu.memory_space<vmem>>, vector<1x120xf32>
    %c3 = arith.constant 3 : index
    %c0_8 = arith.constant 0 : index
    %7 = vector.load %arg7[%c3, %c0_8] : memref<5x144xf32, #tpu.memory_space<vmem>>, vector<1x84xf32>
    %c4 = arith.constant 4 : index
    %c0_9 = arith.constant 0 : index
    %8 = vector.load %arg7[%c4, %c0_9] : memref<5x144xf32, #tpu.memory_space<vmem>>, vector<1x10xf32>
    %c0_10 = arith.constant 0 : index
    %c0_11 = arith.constant 0 : index
    %9 = vector.load %arg5[%c0_10, %c0_11] : memref<212x84xbf16, #tpu.memory_space<vmem>>, vector<120x84xbf16>
    %c128 = arith.constant 128 : index
    %c0_12 = arith.constant 0 : index
    %10 = vector.load %arg5[%c128, %c0_12] : memref<212x84xbf16, #tpu.memory_space<vmem>>, vector<84x10xbf16>
    %c0_13 = arith.constant 0 : index
    %c0_14 = arith.constant 0 : index
    %11 = vector.load %arg1[%c0_13, %c0_14] : memref<56x28xf32, #tpu.memory_space<vmem>>, vector<48x28xf32>
    %c0_15 = arith.constant 0 : index
    %c0_16 = arith.constant 0 : index
    %c0_17 = arith.constant 0 : index
    %12 = vector.load %arg2[%c0_15, %c0_16, %c0_17] : memref<5x28x144xbf16, #tpu.memory_space<vmem>>, vector<1x28x144xbf16>
    %13 = vector.shape_cast %12 : vector<1x28x144xbf16> to vector<28x144xbf16>
    %14 = arith.truncf %11 : vector<48x28xf32> to vector<48x28xbf16>
    %cst = arith.constant dense<0.000000e+00> : vector<48x144xf32>
    %15 = tpu.matmul %14, %13, %cst {dimension_numbers = #tpu.dot_dimension_numbers<[1], [0], [0], [1], [0, 0, 1, 1], [], []>} : vector<48x28xbf16>, vector<28x144xbf16>, vector<48x144xf32> -> vector<48x144xf32>
    %c2_18 = arith.constant 2 : index
    %c0_19 = arith.constant 0 : index
    %16 = vector.load %arg1[%c2_18, %c0_19] : memref<56x28xf32, #tpu.memory_space<vmem>>, vector<48x28xf32>
    %c1_20 = arith.constant 1 : index
    %c0_21 = arith.constant 0 : index
    %c0_22 = arith.constant 0 : index
    %17 = vector.load %arg2[%c1_20, %c0_21, %c0_22] : memref<5x28x144xbf16, #tpu.memory_space<vmem>>, vector<1x28x144xbf16>
    %18 = vector.shape_cast %17 : vector<1x28x144xbf16> to vector<28x144xbf16>
    %19 = arith.truncf %16 : vector<48x28xf32> to vector<48x28xbf16>
    %cst_23 = arith.constant dense<0.000000e+00> : vector<48x144xf32>
    %20 = tpu.matmul %19, %18, %cst_23 {dimension_numbers = #tpu.dot_dimension_numbers<[1], [0], [0], [1], [0, 0, 1, 1], [], []>} : vector<48x28xbf16>, vector<28x144xbf16>, vector<48x144xf32> -> vector<48x144xf32>
    %21 = arith.addf %15, %20 : vector<48x144xf32>
    %c4_24 = arith.constant 4 : index
    %c0_25 = arith.constant 0 : index
    %22 = vector.load %arg1[%c4_24, %c0_25] : memref<56x28xf32, #tpu.memory_space<vmem>>, vector<48x28xf32>
    %c2_26 = arith.constant 2 : index
    %c0_27 = arith.constant 0 : index
    %c0_28 = arith.constant 0 : index
    %23 = vector.load %arg2[%c2_26, %c0_27, %c0_28] : memref<5x28x144xbf16, #tpu.memory_space<vmem>>, vector<1x28x144xbf16>
    %24 = vector.shape_cast %23 : vector<1x28x144xbf16> to vector<28x144xbf16>
    %25 = arith.truncf %22 : vector<48x28xf32> to vector<48x28xbf16>
    %cst_29 = arith.constant dense<0.000000e+00> : vector<48x144xf32>
    %26 = tpu.matmul %25, %24, %cst_29 {dimension_numbers = #tpu.dot_dimension_numbers<[1], [0], [0], [1], [0, 0, 1, 1], [], []>} : vector<48x28xbf16>, vector<28x144xbf16>, vector<48x144xf32> -> vector<48x144xf32>
    %27 = arith.addf %21, %26 : vector<48x144xf32>
    %c6 = arith.constant 6 : index
    %c0_30 = arith.constant 0 : index
    %28 = vector.load %arg1[%c6, %c0_30] : memref<56x28xf32, #tpu.memory_space<vmem>>, vector<48x28xf32>
    %c3_31 = arith.constant 3 : index
    %c0_32 = arith.constant 0 : index
    %c0_33 = arith.constant 0 : index
    %29 = vector.load %arg2[%c3_31, %c0_32, %c0_33] : memref<5x28x144xbf16, #tpu.memory_space<vmem>>, vector<1x28x144xbf16>
    %30 = vector.shape_cast %29 : vector<1x28x144xbf16> to vector<28x144xbf16>
    %31 = arith.truncf %28 : vector<48x28xf32> to vector<48x28xbf16>
    %cst_34 = arith.constant dense<0.000000e+00> : vector<48x144xf32>
    %32 = tpu.matmul %31, %30, %cst_34 {dimension_numbers = #tpu.dot_dimension_numbers<[1], [0], [0], [1], [0, 0, 1, 1], [], []>} : vector<48x28xbf16>, vector<28x144xbf16>, vector<48x144xf32> -> vector<48x144xf32>
    %33 = arith.addf %27, %32 : vector<48x144xf32>
    %c8 = arith.constant 8 : index
    %c0_35 = arith.constant 0 : index
    %34 = vector.load %arg1[%c8, %c0_35] : memref<56x28xf32, #tpu.memory_space<vmem>>, vector<48x28xf32>
    %c4_36 = arith.constant 4 : index
    %c0_37 = arith.constant 0 : index
    %c0_38 = arith.constant 0 : index
    %35 = vector.load %arg2[%c4_36, %c0_37, %c0_38] : memref<5x28x144xbf16, #tpu.memory_space<vmem>>, vector<1x28x144xbf16>
    %36 = vector.shape_cast %35 : vector<1x28x144xbf16> to vector<28x144xbf16>
    %37 = arith.truncf %34 : vector<48x28xf32> to vector<48x28xbf16>
    %cst_39 = arith.constant dense<0.000000e+00> : vector<48x144xf32>
    %38 = tpu.matmul %37, %36, %cst_39 {dimension_numbers = #tpu.dot_dimension_numbers<[1], [0], [0], [1], [0, 0, 1, 1], [], []>} : vector<48x28xbf16>, vector<28x144xbf16>, vector<48x144xf32> -> vector<48x144xf32>
    %39 = arith.addf %33, %38 : vector<48x144xf32>
    %40 = vector.broadcast %4 : vector<1x144xf32> to vector<48x144xf32>
    %41 = arith.addf %39, %40 : vector<48x144xf32>
    %cst_40 = arith.constant 0.000000e+00 : f32
    %42 = vector.broadcast %cst_40 : f32 to vector<48x144xf32>
    %43 = arith.subf %42, %41 : vector<48x144xf32>
    %44 = math.exp %43 : vector<48x144xf32>
    %cst_41 = arith.constant 1.000000e+00 : f32
    %45 = vector.broadcast %cst_41 : f32 to vector<48x144xf32>
    %46 = arith.addf %45, %44 : vector<48x144xf32>
    %47 = tpu.reciprocal %46 {approx = true} : vector<48x144xf32> -> vector<48x144xf32>
    %48 = arith.truncf %47 : vector<48x144xf32> to vector<48x144xbf16>
    %cst_42 = arith.constant dense<0.000000e+00> : vector<48x144xf32>
    %49 = tpu.matmul %2, %48, %cst_42 {dimension_numbers = #tpu.dot_dimension_numbers<[1], [0], [0], [1], [0, 0, 1, 1], [], []>} : vector<48x48xbf16>, vector<48x144xbf16>, vector<48x144xf32> -> vector<48x144xf32>
    %50 = vector.extract_strided_slice %49 {offsets = [0, 0], sizes = [24, 144], strides = [1, 1]} : vector<48x144xf32> to vector<24x144xf32>
    %51 = vector.extract_strided_slice %49 {offsets = [24, 0], sizes = [24, 144], strides = [1, 1]} : vector<48x144xf32> to vector<24x144xf32>
    %52 = arith.maximumf %50, %51 : vector<24x144xf32>
    %53 = arith.truncf %52 : vector<24x144xf32> to vector<24x144xbf16>
    %cst_43 = arith.constant dense<0.000000e+00> : vector<24x200xf32>
    %54 = tpu.matmul %53, %0, %cst_43 {dimension_numbers = #tpu.dot_dimension_numbers<[1], [0], [0], [1], [0, 0, 1, 1], [], []>} : vector<24x144xbf16>, vector<144x200xbf16>, vector<24x200xf32> -> vector<24x200xf32>
    %55 = vector.extract_strided_slice %54 {offsets = [0, 0], sizes = [24, 72], strides = [1, 1]} : vector<24x200xf32> to vector<24x72xf32>
    %56 = vector.extract_strided_slice %54 {offsets = [0, 128], sizes = [24, 72], strides = [1, 1]} : vector<24x200xf32> to vector<24x72xf32>
    %57 = arith.maximumf %55, %56 : vector<24x72xf32>
    %c0_44 = arith.constant 0 : index
    %c0_45 = arith.constant 0 : index
    %58 = vector.load %arg9[%c0_44, %c0_45] : memref<24x72xf32, #tpu.memory_space<vmem>>, vector<24x72xf32>
    tpu.vector_store %arg9[%c0_44, %c0_45], %57 {strides = array<i32>} : memref<24x72xf32, #tpu.memory_space<vmem>>, vector<24x72xf32>,
    %c0_46 = arith.constant 0 : index
    %c0_47 = arith.constant 0 : index
    %59 = vector.load %arg9[%c0_46, %c0_47] : memref<24x72xf32, #tpu.memory_space<vmem>>, vector<16x72xf32>
    %c0_48 = arith.constant 0 : index
    %c0_49 = arith.constant 0 : index
    %c0_50 = arith.constant 0 : index
    %60 = vector.load %arg3[%c0_48, %c0_49, %c0_50] : memref<5x72x128xbf16, #tpu.memory_space<vmem>>, vector<1x72x128xbf16>
    %61 = vector.shape_cast %60 : vector<1x72x128xbf16> to vector<72x128xbf16>
    %62 = arith.truncf %59 : vector<16x72xf32> to vector<16x72xbf16>
    %cst_51 = arith.constant dense<0.000000e+00> : vector<16x128xf32>
    %63 = tpu.matmul %62, %61, %cst_51 {dimension_numbers = #tpu.dot_dimension_numbers<[1], [0], [0], [1], [0, 0, 1, 1], [], []>} : vector<16x72xbf16>, vector<72x128xbf16>, vector<16x128xf32> -> vector<16x128xf32>
    %c2_52 = arith.constant 2 : index
    %c0_53 = arith.constant 0 : index
    %64 = vector.load %arg9[%c2_52, %c0_53] : memref<24x72xf32, #tpu.memory_space<vmem>>, vector<16x72xf32>
    %c1_54 = arith.constant 1 : index
    %c0_55 = arith.constant 0 : index
    %c0_56 = arith.constant 0 : index
    %65 = vector.load %arg3[%c1_54, %c0_55, %c0_56] : memref<5x72x128xbf16, #tpu.memory_space<vmem>>, vector<1x72x128xbf16>
    %66 = vector.shape_cast %65 : vector<1x72x128xbf16> to vector<72x128xbf16>
    %67 = arith.truncf %64 : vector<16x72xf32> to vector<16x72xbf16>
    %cst_57 = arith.constant dense<0.000000e+00> : vector<16x128xf32>
    %68 = tpu.matmul %67, %66, %cst_57 {dimension_numbers = #tpu.dot_dimension_numbers<[1], [0], [0], [1], [0, 0, 1, 1], [], []>} : vector<16x72xbf16>, vector<72x128xbf16>, vector<16x128xf32> -> vector<16x128xf32>
    %69 = arith.addf %63, %68 : vector<16x128xf32>
    %c4_58 = arith.constant 4 : index
    %c0_59 = arith.constant 0 : index
    %70 = vector.load %arg9[%c4_58, %c0_59] : memref<24x72xf32, #tpu.memory_space<vmem>>, vector<16x72xf32>
    %c2_60 = arith.constant 2 : index
    %c0_61 = arith.constant 0 : index
    %c0_62 = arith.constant 0 : index
    %71 = vector.load %arg3[%c2_60, %c0_61, %c0_62] : memref<5x72x128xbf16, #tpu.memory_space<vmem>>, vector<1x72x128xbf16>
    %72 = vector.shape_cast %71 : vector<1x72x128xbf16> to vector<72x128xbf16>
    %73 = arith.truncf %70 : vector<16x72xf32> to vector<16x72xbf16>
    %cst_63 = arith.constant dense<0.000000e+00> : vector<16x128xf32>
    %74 = tpu.matmul %73, %72, %cst_63 {dimension_numbers = #tpu.dot_dimension_numbers<[1], [0], [0], [1], [0, 0, 1, 1], [], []>} : vector<16x72xbf16>, vector<72x128xbf16>, vector<16x128xf32> -> vector<16x128xf32>
    %75 = arith.addf %69, %74 : vector<16x128xf32>
    %c6_64 = arith.constant 6 : index
    %c0_65 = arith.constant 0 : index
    %76 = vector.load %arg9[%c6_64, %c0_65] : memref<24x72xf32, #tpu.memory_space<vmem>>, vector<16x72xf32>
    %c3_66 = arith.constant 3 : index
    %c0_67 = arith.constant 0 : index
    %c0_68 = arith.constant 0 : index
    %77 = vector.load %arg3[%c3_66, %c0_67, %c0_68] : memref<5x72x128xbf16, #tpu.memory_space<vmem>>, vector<1x72x128xbf16>
    %78 = vector.shape_cast %77 : vector<1x72x128xbf16> to vector<72x128xbf16>
    %79 = arith.truncf %76 : vector<16x72xf32> to vector<16x72xbf16>
    %cst_69 = arith.constant dense<0.000000e+00> : vector<16x128xf32>
    %80 = tpu.matmul %79, %78, %cst_69 {dimension_numbers = #tpu.dot_dimension_numbers<[1], [0], [0], [1], [0, 0, 1, 1], [], []>} : vector<16x72xbf16>, vector<72x128xbf16>, vector<16x128xf32> -> vector<16x128xf32>
    %81 = arith.addf %75, %80 : vector<16x128xf32>
    %c8_70 = arith.constant 8 : index
    %c0_71 = arith.constant 0 : index
    %82 = vector.load %arg9[%c8_70, %c0_71] : memref<24x72xf32, #tpu.memory_space<vmem>>, vector<16x72xf32>
    %c4_72 = arith.constant 4 : index
    %c0_73 = arith.constant 0 : index
    %c0_74 = arith.constant 0 : index
    %83 = vector.load %arg3[%c4_72, %c0_73, %c0_74] : memref<5x72x128xbf16, #tpu.memory_space<vmem>>, vector<1x72x128xbf16>
    %84 = vector.shape_cast %83 : vector<1x72x128xbf16> to vector<72x128xbf16>
    %85 = arith.truncf %82 : vector<16x72xf32> to vector<16x72xbf16>
    %cst_75 = arith.constant dense<0.000000e+00> : vector<16x128xf32>
    %86 = tpu.matmul %85, %84, %cst_75 {dimension_numbers = #tpu.dot_dimension_numbers<[1], [0], [0], [1], [0, 0, 1, 1], [], []>} : vector<16x72xbf16>, vector<72x128xbf16>, vector<16x128xf32> -> vector<16x128xf32>
    %87 = arith.addf %81, %86 : vector<16x128xf32>
    %88 = vector.broadcast %5 : vector<1x128xf32> to vector<16x128xf32>
    %89 = arith.addf %87, %88 : vector<16x128xf32>
    %cst_76 = arith.constant 0.000000e+00 : f32
    %90 = vector.broadcast %cst_76 : f32 to vector<16x128xf32>
    %91 = arith.subf %90, %89 : vector<16x128xf32>
    %92 = math.exp %91 : vector<16x128xf32>
    %cst_77 = arith.constant 1.000000e+00 : f32
    %93 = vector.broadcast %cst_77 : f32 to vector<16x128xf32>
    %94 = arith.addf %93, %92 : vector<16x128xf32>
    %95 = tpu.reciprocal %94 {approx = true} : vector<16x128xf32> -> vector<16x128xf32>
    %96 = arith.truncf %95 : vector<16x128xf32> to vector<16x128xbf16>
    %cst_78 = arith.constant dense<0.000000e+00> : vector<16x128xf32>
    %97 = tpu.matmul %3, %96, %cst_78 {dimension_numbers = #tpu.dot_dimension_numbers<[1], [0], [0], [1], [0, 0, 1, 1], [], []>} : vector<16x16xbf16>, vector<16x128xbf16>, vector<16x128xf32> -> vector<16x128xf32>
    %98 = vector.extract_strided_slice %97 {offsets = [0, 0], sizes = [8, 128], strides = [1, 1]} : vector<16x128xf32> to vector<8x128xf32>
    %99 = vector.extract_strided_slice %97 {offsets = [8, 0], sizes = [8, 128], strides = [1, 1]} : vector<16x128xf32> to vector<8x128xf32>
    %100 = arith.maximumf %98, %99 : vector<8x128xf32>
    %101 = arith.truncf %100 : vector<8x128xf32> to vector<8x128xbf16>
    %cst_79 = arith.constant dense<0.000000e+00> : vector<8x192xf32>
    %102 = tpu.matmul %101, %1, %cst_79 {dimension_numbers = #tpu.dot_dimension_numbers<[1], [0], [0], [1], [0, 0, 1, 1], [], []>} : vector<8x128xbf16>, vector<128x192xbf16>, vector<8x192xf32> -> vector<8x192xf32>
    %103 = vector.extract_strided_slice %102 {offsets = [0, 0], sizes = [8, 64], strides = [1, 1]} : vector<8x192xf32> to vector<8x64xf32>
    %104 = vector.extract_strided_slice %102 {offsets = [0, 128], sizes = [8, 64], strides = [1, 1]} : vector<8x192xf32> to vector<8x64xf32>
    %105 = arith.maximumf %103, %104 : vector<8x64xf32>
    %c0_80 = arith.constant 0 : index
    %c0_81 = arith.constant 0 : index
    %106 = vector.load %arg10[%c0_80, %c0_81] : memref<8x64xf32, #tpu.memory_space<vmem>>, vector<8x64xf32>
    tpu.vector_store %arg10[%c0_80, %c0_81], %105 {strides = array<i32>} : memref<8x64xf32, #tpu.memory_space<vmem>>, vector<8x64xf32>,
    %c0_82 = arith.constant 0 : index
    %c0_83 = arith.constant 0 : index
    %107 = vector.load %arg10[%c0_82, %c0_83] : memref<8x64xf32, #tpu.memory_space<vmem>>, vector<2x64xf32>
    %c0_84 = arith.constant 0 : index
    %c0_85 = arith.constant 0 : index
    %c0_86 = arith.constant 0 : index
    %108 = vector.load %arg4[%c0_84, %c0_85, %c0_86] : memref<4x64x120xbf16, #tpu.memory_space<vmem>>, vector<1x64x120xbf16>
    %109 = vector.shape_cast %108 : vector<1x64x120xbf16> to vector<64x120xbf16>
    %110 = arith.truncf %107 : vector<2x64xf32> to vector<2x64xbf16>
    %cst_87 = arith.constant dense<0.000000e+00> : vector<2x120xf32>
    %111 = tpu.matmul %110, %109, %cst_87 {dimension_numbers = #tpu.dot_dimension_numbers<[1], [0], [0], [1], [0, 0, 1, 1], [], []>} : vector<2x64xbf16>, vector<64x120xbf16>, vector<2x120xf32> -> vector<2x120xf32>
    %c2_88 = arith.constant 2 : index
    %c0_89 = arith.constant 0 : index
    %112 = vector.load %arg10[%c2_88, %c0_89] : memref<8x64xf32, #tpu.memory_space<vmem>>, vector<2x64xf32>
    %c1_90 = arith.constant 1 : index
    %c0_91 = arith.constant 0 : index
    %c0_92 = arith.constant 0 : index
    %113 = vector.load %arg4[%c1_90, %c0_91, %c0_92] : memref<4x64x120xbf16, #tpu.memory_space<vmem>>, vector<1x64x120xbf16>
    %114 = vector.shape_cast %113 : vector<1x64x120xbf16> to vector<64x120xbf16>
    %115 = arith.truncf %112 : vector<2x64xf32> to vector<2x64xbf16>
    %cst_93 = arith.constant dense<0.000000e+00> : vector<2x120xf32>
    %116 = tpu.matmul %115, %114, %cst_93 {dimension_numbers = #tpu.dot_dimension_numbers<[1], [0], [0], [1], [0, 0, 1, 1], [], []>} : vector<2x64xbf16>, vector<64x120xbf16>, vector<2x120xf32> -> vector<2x120xf32>
    %117 = arith.addf %111, %116 : vector<2x120xf32>
    %c4_94 = arith.constant 4 : index
    %c0_95 = arith.constant 0 : index
    %118 = vector.load %arg10[%c4_94, %c0_95] : memref<8x64xf32, #tpu.memory_space<vmem>>, vector<2x64xf32>
    %c2_96 = arith.constant 2 : index
    %c0_97 = arith.constant 0 : index
    %c0_98 = arith.constant 0 : index
    %119 = vector.load %arg4[%c2_96, %c0_97, %c0_98] : memref<4x64x120xbf16, #tpu.memory_space<vmem>>, vector<1x64x120xbf16>
    %120 = vector.shape_cast %119 : vector<1x64x120xbf16> to vector<64x120xbf16>
    %121 = arith.truncf %118 : vector<2x64xf32> to vector<2x64xbf16>
    %cst_99 = arith.constant dense<0.000000e+00> : vector<2x120xf32>
    %122 = tpu.matmul %121, %120, %cst_99 {dimension_numbers = #tpu.dot_dimension_numbers<[1], [0], [0], [1], [0, 0, 1, 1], [], []>} : vector<2x64xbf16>, vector<64x120xbf16>, vector<2x120xf32> -> vector<2x120xf32>
    %123 = arith.addf %117, %122 : vector<2x120xf32>
    %c6_100 = arith.constant 6 : index
    %c0_101 = arith.constant 0 : index
    %124 = vector.load %arg10[%c6_100, %c0_101] : memref<8x64xf32, #tpu.memory_space<vmem>>, vector<2x64xf32>
    %c3_102 = arith.constant 3 : index
    %c0_103 = arith.constant 0 : index
    %c0_104 = arith.constant 0 : index
    %125 = vector.load %arg4[%c3_102, %c0_103, %c0_104] : memref<4x64x120xbf16, #tpu.memory_space<vmem>>, vector<1x64x120xbf16>
    %126 = vector.shape_cast %125 : vector<1x64x120xbf16> to vector<64x120xbf16>
    %127 = arith.truncf %124 : vector<2x64xf32> to vector<2x64xbf16>
    %cst_105 = arith.constant dense<0.000000e+00> : vector<2x120xf32>
    %128 = tpu.matmul %127, %126, %cst_105 {dimension_numbers = #tpu.dot_dimension_numbers<[1], [0], [0], [1], [0, 0, 1, 1], [], []>} : vector<2x64xbf16>, vector<64x120xbf16>, vector<2x120xf32> -> vector<2x120xf32>
    %129 = arith.addf %123, %128 : vector<2x120xf32>
    %130 = vector.broadcast %6 : vector<1x120xf32> to vector<2x120xf32>
    %131 = arith.addf %129, %130 : vector<2x120xf32>
    %cst_106 = arith.constant 0.000000e+00 : f32
    %132 = vector.broadcast %cst_106 : f32 to vector<2x120xf32>
    %133 = arith.subf %132, %131 : vector<2x120xf32>
    %134 = math.exp %133 : vector<2x120xf32>
    %cst_107 = arith.constant 1.000000e+00 : f32
    %135 = vector.broadcast %cst_107 : f32 to vector<2x120xf32>
    %136 = arith.addf %135, %134 : vector<2x120xf32>
    %137 = tpu.reciprocal %136 {approx = true} : vector<2x120xf32> -> vector<2x120xf32>
    %138 = arith.truncf %137 : vector<2x120xf32> to vector<2x120xbf16>
    %cst_108 = arith.constant dense<0.000000e+00> : vector<2x84xf32>
    %139 = tpu.matmul %138, %9, %cst_108 {dimension_numbers = #tpu.dot_dimension_numbers<[1], [0], [0], [1], [0, 0, 1, 1], [], []>} : vector<2x120xbf16>, vector<120x84xbf16>, vector<2x84xf32> -> vector<2x84xf32>
    %140 = vector.broadcast %7 : vector<1x84xf32> to vector<2x84xf32>
    %141 = arith.addf %139, %140 : vector<2x84xf32>
    %cst_109 = arith.constant 0.000000e+00 : f32
    %142 = vector.broadcast %cst_109 : f32 to vector<2x84xf32>
    %143 = arith.subf %142, %141 : vector<2x84xf32>
    %144 = math.exp %143 : vector<2x84xf32>
    %cst_110 = arith.constant 1.000000e+00 : f32
    %145 = vector.broadcast %cst_110 : f32 to vector<2x84xf32>
    %146 = arith.addf %145, %144 : vector<2x84xf32>
    %147 = tpu.reciprocal %146 {approx = true} : vector<2x84xf32> -> vector<2x84xf32>
    %148 = arith.truncf %147 : vector<2x84xf32> to vector<2x84xbf16>
    %cst_111 = arith.constant dense<0.000000e+00> : vector<2x10xf32>
    %149 = tpu.matmul %148, %10, %cst_111 {dimension_numbers = #tpu.dot_dimension_numbers<[1], [0], [0], [1], [0, 0, 1, 1], [], []>} : vector<2x84xbf16>, vector<84x10xbf16>, vector<2x10xf32> -> vector<2x10xf32>
    %150 = vector.broadcast %8 : vector<1x10xf32> to vector<2x10xf32>
    %151 = arith.addf %149, %150 : vector<2x10xf32>
    %cst_112 = arith.constant dense<0xFF800000> : vector<2xf32>
    %152 = vector.multi_reduction <maximumf>, %151, %cst_112 [1] : vector<2x10xf32> to vector<2xf32>
    %153 = vector.shape_cast %152 : vector<2xf32> to vector<2x1xf32>
    %154 = vector.broadcast %153 : vector<2x1xf32> to vector<2x10xf32>
    %155 = arith.subf %151, %154 : vector<2x10xf32>
    %156 = math.exp %155 : vector<2x10xf32>
    %cst_113 = arith.constant dense<0.000000e+00> : vector<2xf32>
    %157 = vector.multi_reduction <add>, %156, %cst_113 [1] : vector<2x10xf32> to vector<2xf32>
    %158 = vector.shape_cast %157 : vector<2xf32> to vector<2x1xf32>
    %159 = math.log %158 : vector<2x1xf32>
    %160 = vector.broadcast %153 : vector<2x1xf32> to vector<2x10xf32>
    %161 = arith.subf %151, %160 : vector<2x10xf32>
    %162 = vector.broadcast %159 : vector<2x1xf32> to vector<2x10xf32>
    %163 = arith.subf %161, %162 : vector<2x10xf32>
    %c0_114 = arith.constant 0 : index
    %c0_115 = arith.constant 0 : index
    %164 = vector.load %arg8[%c0_114, %c0_115] : memref<2x10xf32, #tpu.memory_space<vmem>>, vector<2x10xf32>
    tpu.vector_store %arg8[%c0_114, %c0_115], %163 {strides = array<i32>} : memref<2x10xf32, #tpu.memory_space<vmem>>, vector<2x10xf32>,
    return
  }
  func.func @transform_0(%arg0: i32) -> (i32, i32) {
    %c0_i32 = arith.constant 0 : i32
    %c0_i32_0 = arith.constant 0 : i32
    %c0_i32_1 = arith.constant 0 : i32
    return %c0_i32, %c0_i32_0 : i32, i32
  }
  func.func @transform_1(%arg0: i32) -> (i32, i32, i32) {
    %c0_i32 = arith.constant 0 : i32
    %c0_i32_0 = arith.constant 0 : i32
    %c0_i32_1 = arith.constant 0 : i32
    %c0_i32_2 = arith.constant 0 : i32
    return %c0_i32, %c0_i32_0, %c0_i32_1 : i32, i32, i32
  }
  func.func @transform_2(%arg0: i32) -> (i32, i32, i32) {
    %c0_i32 = arith.constant 0 : i32
    %c0_i32_0 = arith.constant 0 : i32
    %c0_i32_1 = arith.constant 0 : i32
    %c0_i32_2 = arith.constant 0 : i32
    return %c0_i32, %c0_i32_0, %c0_i32_1 : i32, i32, i32
  }
  func.func @transform_3(%arg0: i32) -> (i32, i32, i32) {
    %c0_i32 = arith.constant 0 : i32
    %c0_i32_0 = arith.constant 0 : i32
    %c0_i32_1 = arith.constant 0 : i32
    %c0_i32_2 = arith.constant 0 : i32
    return %c0_i32, %c0_i32_0, %c0_i32_1 : i32, i32, i32
  }
  func.func @transform_4(%arg0: i32) -> (i32, i32) {
    %c0_i32 = arith.constant 0 : i32
    %c0_i32_0 = arith.constant 0 : i32
    %c0_i32_1 = arith.constant 0 : i32
    return %c0_i32, %c0_i32_0 : i32, i32
  }
  func.func @transform_5(%arg0: i32) -> (i32, i32) {
    %c0_i32 = arith.constant 0 : i32
    %c0_i32_0 = arith.constant 0 : i32
    %c0_i32_1 = arith.constant 0 : i32
    return %c0_i32, %c0_i32_0 : i32, i32
  }
  func.func @transform_6(%arg0: i32) -> (i32, i32) {
    %c0_i32 = arith.constant 0 : i32
    %c0_i32_0 = arith.constant 0 : i32
    %c0_i32_1 = arith.constant 0 : i32
    return %c0_i32, %c0_i32_0 : i32, i32
  }
  func.func @transform_7(%arg0: i32) -> (i32, i32) {
    %c0_i32 = arith.constant 0 : i32
    %c0_i32_0 = arith.constant 0 : i32
    %c0_i32_1 = arith.constant 0 : i32
    return %c0_i32, %c0_i32_0 : i32, i32
  }
}

</mosaic_0001>

<bundles_post_ra>
// kernel: firstnet_forward.1
= control target key start
LH: loop header
LB: loop body
LE: loop exit
PB: predicated region body
PF: predicated region fallthrough
CT: control target
= control target key end

     0   :  { %vm156_vm0 = vcmask 1045504   ;;  %v2924_v2 = vmov 0   ;;  %vm146_vm1 = vcmask 228352   ;;  %s3583_s0 = inlined_call_operand.vmem [shape: f32[56,28], index: 0, kind: input, shape index: {}]   ;;  %s3584_s1 = inlined_call_operand.vmem [shape: bf16[5,28,144], index: 1, kind: input, shape index: {}]   ;;  %s3585_s2 = inlined_call_operand.vmem [shape: bf16[5,72,128], index: 2, kind: input, shape index: {}]   ;;  %s3586_s3 = inlined_call_operand.vmem [shape: bf16[4,64,120], index: 3, kind: input, shape index: {}]   ;;  %s3587_s4 = inlined_call_operand.vmem [shape: bf16[212,84], index: 4, kind: input, shape index: {}]   ;;  %s3588_s5 = inlined_call_operand.vmem [shape: bf16[336,200], index: 5, kind: input, shape index: {}]   ;;  %s3589_s6 = inlined_call_operand.vmem [shape: f32[5,144], index: 6, kind: input, shape index: {}]   ;;  %s3590_s7 = inlined_call_operand.hbm [shape: f32[2,10], index: 7, kind: output, shape index: {}]  }
   0x1   :  { %v2692_v0 = vld [vmem:[%s3584_s1 + $0x24] ss:$8 sps:$4 sm:$0xff]   ;;  %v2694_v1 = vld [vmem:[%s3584_s1 + $0x20] ss:$8 sps:$4 sm:$0xff]   ;;  %195 = vmatprep.mubr.bf16.mxu0 %v2924_v2  ;;  %834 = vmatprep.mubr.bf16.mxu1 %v2924_v2  ;;  %v116_v13 = vld [vmem:[%s3583_s0 + $0x12] sm:$0xff] }
   0x2   :  { %163 = vmatprep.subr.bf16.mxu0 %v2692_v0  ;;  %v2695_v3 = vld [vmem:[%s3584_s1 + $0x34] ss:$8 sps:$4 sm:$0x3f]   ;;  %v2697_v4 = vld [vmem:[%s3584_s1 + $0x30] ss:$8 sps:$4 sm:$0x3f]  }
   0x3   :  { %164 = vmatpush1.bf16.msra.mxu0 %v2694_v1  ;;  %v114_v5 = vld [vmem:[%s3583_s0 + $0x2] sm:$0xff]  ;;  %v115_v6 = vld [vmem:[%s3583_s0 + $0xa] sm:$0xff]  ;;  %v158_v7 = vsel %vm156_vm0, %v2697_v4, 0  ;;  %v2701_v11 = vld [vmem:[%s3584_s1 + $0x14] ss:$8 sps:$4 sm:$0x3f]  }
   0x4   :  { %2194 = vmatprep.subr.msk.bf16.mxu0 %vm156_vm0, %v2695_v3  ;;  %v2700_v8 = vld [vmem:[%s3584_s1 + $0x4] ss:$8 sps:$4 sm:$0xff]   ;;  %v125_v9 = vpack.c.bf16 %v115_v6, %v114_v5  ;;  %v2698_v10 = vld [vmem:[%s3584_s1] ss:$8 sps:$4 sm:$0xff]   ;;  %v3014_v15 = vld [vmem:[%s3583_s0 + $0x10] sm:$0xff] }
   0x5   :  { %v2703_v12 = vld [vmem:[%s3584_s1 + $0x10] ss:$8 sps:$4 sm:$0x3f]   ;;  %v3008_v14 = vld [vmem:[%s3583_s0 + $0x8] sm:$0xff]  ;;  %v3024_v17 = vld [vmem:[%s3583_s0 + $0x20] sm:$0xff] }
   0x6   :  { %v3019_v16 = vld [vmem:[%s3583_s0 + $0x18] sm:$0xff]  ;;  %v577_v19 = vpack.c.bf16 %v3014_v15, %v3008_v14  ;;  %v254_v21 = vsel %vm156_vm0, %v2703_v12, 0  ;;  %v2706_v22 = vld [vmem:[%s3584_s1 + $0x44] ss:$8 sps:$4 sm:$0xff]   ;;  %v2704_v29 = vld [vmem:[%s3584_s1 + $0x40] ss:$8 sps:$4 sm:$0xff]  }
   0x7   :  { %166 = vmatpush1.bf16.msra.mxu0 %v158_v7  ;;  %v117_v18 = vld [vmem:[%s3583_s0 + $0x1a] sm:$0xff]  ;;  %v578_v20 = vpack.c.bf16 %v3024_v17, %v3019_v16  ;;  %v118_v24 = vld [vmem:[%s3583_s0 + $0x22] sm:$0xff]  ;;  %v119_v25 = vld [vmem:[%s3583_s0 + $0x2a] sm:$0xff]  ;;  %v112_v34 = vpack.c.bf16 %v3019_v16, %v3014_v15 }
   0x8   :  { %259 = vmatprep.subr.bf16.mxu0 %v2700_v8  ;;  %v126_v23 = vpack.c.bf16 %v117_v18, %v116_v13  ;;  %v127_v26 = vpack.c.bf16 %v119_v25, %v118_v24  ;;  %v101_v27 = vld [vmem:[%s3583_s0] sm:$0xff]  ;;  %v2709_v28 = vld [vmem:[%s3584_s1 + $0x50] ss:$8 sps:$4 sm:$0x3f]   ;;  %v106_v35 = vld [vmem:[%s3583_s0 + $0x28] sm:$0xff] }
   0x9   :  { %v111_v30 = vpack.c.bf16 %v3008_v14, %v101_v27  ;;  %v2707_v31 = vld [vmem:[%s3584_s1 + $0x54] ss:$8 sps:$4 sm:$0x3f]   ;;  %v364_v32 = vsel %vm156_vm0, %v2709_v28, 0  ;;  %v2712_v33 = vld [vmem:[%s3584_s1 + $0x64] ss:$8 sps:$4 sm:$0xff]   ;;  %v113_v36 = vpack.c.bf16 %v106_v35, %v3024_v17 }
   0xa   :  { %2195 = vmatmul.mubr.msk.bf16.vlgmr.msra.gmra.mrb[0].mxu0 %vm146_vm1, %v125_v9  ;;  %v2715_v37 = vld [vmem:[%s3584_s1 + $0x70] ss:$8 sps:$4 sm:$0x3f]   ;;  %v322_v38 = vld [vmem:[%s3583_s0 + $0x4] sm:$0xff]  ;;  %v325_v45 = vld [vmem:[%s3583_s0 + $0x1c] sm:$0xff] }
   0xb   :  { %260 = vmatpush1.bf16.msra.mxu0 %v2698_v10  ;;  %205 = vmatprep.mubr.bf16.mxu0 %v2924_v2  ;;  %v323_v39 = vld [vmem:[%s3583_s0 + $0xc] sm:$0xff]  ;;  %v486_v40 = vsel %vm156_vm0, %v2715_v37, 0  ;;  %v2710_v41 = vld [vmem:[%s3584_s1 + $0x60] ss:$8 sps:$4 sm:$0xff]   ;;  %v324_v44 = vld [vmem:[%s3583_s0 + $0x14] sm:$0xff] }
   0xc   :  { %2202 = vmatprep.subr.msk.bf16.mxu0 %vm156_vm0, %v2701_v11  ;;  %v333_v42 = vpack.c.bf16 %v323_v39, %v322_v38  ;;  %v2713_v43 = vld [vmem:[%s3584_s1 + $0x74] ss:$8 sps:$4 sm:$0x3f]   ;;  %v2718_v46 = vld [vmem:[%s3584_s1 + $0x84] ss:$8 sps:$4 sm:$0xff]   ;;  %v334_v47 = vpack.c.bf16 %v325_v45, %v324_v44 }
   0xd   :  { %v326_v48 = vld [vmem:[%s3583_s0 + $0x24] sm:$0xff]  ;;  %v327_v49 = vld [vmem:[%s3583_s0 + $0x2c] sm:$0xff] }
   0xe   :  { %v335_v50 = vpack.c.bf16 %v327_v49, %v326_v48 }
   0xf   :  { %262 = vmatpush1.bf16.msra.mxu0 %v254_v21 }
  0x10   :  { %369 = vmatprep.subr.bf16.mxu0 %v2706_v22 }
  0x12   :  { %2196 = vmatmul.mubr.msk.bf16.gmra.mrb[4].mxu0 %vm146_vm1, %v126_v23 }
  0x13   :  { %215 = vmatprep.mubr.bf16.mxu0 %v2924_v2 }
  0x1a   :  { %2197 = vmatmul.mubr.msk.bf16.gmra.mrb[8].mxu0 %vm146_vm1, %v127_v26 }
  0x1b   :  { %291 = vmatprep.mubr.bf16.mxu0 %v2924_v2 }
  0x22   :  { %2203 = vmatmul.mubr.msk.bf16.vlgmr.msra.gmra.mrb[0].mxu0 %vm146_vm1, %v111_v30 }
  0x23   :  { %370 = vmatpush1.bf16.msra.mxu0 %v2704_v29  ;;  %301 = vmatprep.mubr.bf16.mxu0 %v2924_v2 }
  0x24   :  { %2214 = vmatprep.subr.msk.bf16.mxu0 %vm156_vm0, %v2707_v31 }
  0x27   :  { %372 = vmatpush1.bf16.msra.mxu0 %v364_v32 }
  0x28   :  { %491 = vmatprep.subr.bf16.mxu0 %v2712_v33 }
  0x2a   :  { %2204 = vmatmul.mubr.msk.bf16.gmra.mrb[4].mxu0 %vm146_vm1, %v112_v34 }
  0x2b   :  { %311 = vmatprep.mubr.bf16.mxu0 %v2924_v2 }
  0x32   :  { %2205 = vmatmul.mubr.msk.bf16.gmra.mrb[8].mxu0 %vm146_vm1, %v113_v36 }
  0x33   :  { %401 = vmatprep.mubr.bf16.mxu0 %v2924_v2 }
  0x3a   :  { %2215 = vmatmul.mubr.msk.bf16.vlgmr.msra.gmra.mrb[0].mxu0 %vm146_vm1, %v333_v42 }
  0x3b   :  { %492 = vmatpush1.bf16.msra.mxu0 %v2710_v41  ;;  %411 = vmatprep.mubr.bf16.mxu0 %v2924_v2 }
  0x3c   :  { %2226 = vmatprep.subr.msk.bf16.mxu0 %vm156_vm0, %v2713_v43 }
  0x3f   :  { %494 = vmatpush1.bf16.msra.mxu0 %v486_v40 }
  0x40   :  { %613 = vmatprep.subr.bf16.mxu0 %v2718_v46 }
  0x42   :  { %2216 = vmatmul.mubr.msk.bf16.gmra.mrb[4].mxu0 %vm146_vm1, %v334_v47 }
  0x43   :  { %421 = vmatprep.mubr.bf16.mxu0 %v2924_v2 }
  0x44   :  { %12 = vsyncpa [#allocation5], 0  ;;  %v444_v51 = vld [vmem:[%s3583_s0 + $0x6] sm:$0xff]  ;;  %v445_v52 = vld [vmem:[%s3583_s0 + $0xe] sm:$0xff]  ;;  %v689_v3 = vlaneseq  ;;  %vm792_vm2 = vcmask 392192   ;;  %vm965_vm3 = vcmask 130048  }
  0x45   :  { %v455_v53 = vpack.c.bf16 %v445_v52, %v444_v51  ;;  %v2716_v54 = vld [vmem:[%s3584_s1 + $0x80] ss:$8 sps:$4 sm:$0xff]   ;;  %v2719_v55 = vld [vmem:[%s3584_s1 + $0x94] ss:$8 sps:$4 sm:$0x3f]   ;;  %vm1085_vm4 = vcmask 1043456  }
  0x46   :  { %v2721_v56 = vld [vmem:[%s3584_s1 + $0x90] ss:$8 sps:$4 sm:$0x3f]   ;;  %v447_v58 = vld [vmem:[%s3583_s0 + $0x1e] sm:$0xff]  ;;  %v448_v61 = vld [vmem:[%s3583_s0 + $0x26] sm:$0xff]  ;;  %v690_v4 = vshrl.u32 %v689_v3, 7 }
  0x47   :  { %v446_v57 = vld [vmem:[%s3583_s0 + $0x16] sm:$0xff]  ;;  %v608_v59 = vsel %vm156_vm0, %v2721_v56, 0  ;;  %v449_v62 = vld [vmem:[%s3583_s0 + $0x2e] sm:$0xff]  ;;  %v70_v6 = vld [vmem:[%s3589_s6] ss:$8 sm:$0x3] }
  0x48   :  { %v456_v60 = vpack.c.bf16 %v447_v58, %v446_v57  ;;  %v457_v63 = vpack.c.bf16 %v449_v62, %v448_v61  ;;  %v571_v0 = vld [vmem:[%s3583_s0 + $0x30] sm:$0xff]  ;;  %v691_v5 = vsub.s32 0, %v690_v4  ;;  %v695_v7 = vsub.s32 1, %v690_v4 }
  0x49   :  { %v579_v1 = vpack.c.bf16 %v571_v0, %v106_v35  ;;  %vm2926_vm5 = vmmov 0   ;;  %vm1026_vm6 = vcmask 588800   ;;  %vm1657_vm7 = vcmask 523264  }
  0x4a   :  { %2217 = vmatmul.mubr.msk.bf16.gmra.mrb[8].mxu0 %vm146_vm1, %v335_v50  ;;  %v692_v8 = vrot.slane %v70_v6, %v691_v5  ;;  %v696_v9 = vrot.slane %v70_v6, %v695_v7  ;;  %vm2024_vm8 = vcmask 982016   ;;  %vm2114_vm9 = vcmask 1041408  }
  0x4b   :  { %523 = vmatprep.mubr.bf16.mxu0 %v2924_v2  ;;  %vm2110_vm10 = vcmask 687104   ;;  %vm2158_vm11 = vcmask 74752  }
  0x52   :  { %2227 = vmatmul.mubr.msk.bf16.vlgmr.msra.gmra.mrb[0].mxu0 %vm146_vm1, %v455_v53 }
  0x53   :  { %614 = vmatpush1.bf16.msra.mxu0 %v2716_v54  ;;  %533 = vmatprep.mubr.bf16.mxu0 %v2924_v2 }
  0x54   :  { %2238 = vmatprep.subr.msk.bf16.mxu0 %vm156_vm0, %v2719_v55 }
  0x57   :  { %616 = vmatpush1.bf16.msra.mxu0 %v608_v59 }
  0x5a   :  { %2228 = vmatmul.mubr.msk.bf16.gmra.mrb[4].mxu0 %vm146_vm1, %v456_v60 }
  0x5b   :  { %543 = vmatprep.mubr.bf16.mxu0 %v2924_v2 }
  0x62   :  { %2229 = vmatmul.mubr.msk.bf16.gmra.mrb[8].mxu0 %vm146_vm1, %v457_v63 }
  0x63   :  { %645 = vmatprep.mubr.bf16.mxu0 %v2924_v2 }
  0x6a   :  { %2239 = vmatmul.mubr.msk.bf16.vlgmr.msra.gmra.mrb[0].mxu0 %vm146_vm1, %v577_v19 }
  0x6b   :  { %655 = vmatprep.mubr.bf16.mxu0 %v2924_v2 }
  0x72   :  { %2240 = vmatmul.mubr.msk.bf16.gmra.mrb[4].mxu0 %vm146_vm1, %v578_v20 }
  0x73   :  { %665 = vmatprep.mubr.bf16.mxu0 %v2924_v2 }
  0x7a   :  { %2241 = vmatmul.mubr.msk.bf16.gmra.mrb[8].mxu0 %vm146_vm1, %v579_v1 }
 0x13d   :  { %v647_v10 = vpop.f32.mrb[0].mxu0 }
 0x13e   :  { %v699_v11 = vadd.f32 %v692_v8, %v647_v10  ;;  %v649_v12 = vpop.f32.mrb[1].mxu0 }
 0x13f   :  { %v700_v13 = vadd.f32 %v696_v9, %v649_v12  ;;  %v651_v14 = vpop.f32.mrb[2].mxu0 }
 0x140   :  { %v711_v15 = vsub.f32 0.0, %v699_v11  ;;  %v701_v16 = vadd.f32 %v692_v8, %v651_v14  ;;  %v653_v17 = vpop.f32.mrb[3].mxu0 }
 0x141   :  { %v712_v18 = vsub.f32 0.0, %v700_v13  ;;  %v702_v19 = vadd.f32 %v696_v9, %v653_v17 }
 0x142   :  { %v723_v20 = vmul.f32 1.442695, %v711_v15  ;;  %v713_v21 = vsub.f32 0.0, %v701_v16 }
 0x143   :  { %v725_v22 = vmul.f32 1.442695, %v712_v18  ;;  %v714_v23 = vsub.f32 0.0, %v702_v19 }
 0x144   :  { %2832 = vpow2.f32 %v723_v20  ;;  %v727_v24 = vmul.f32 1.442695, %v713_v21 }
 0x145   :  { %2834 = vpow2.f32 %v725_v22  ;;  %v729_v25 = vmul.f32 1.442695, %v714_v23  ;;  %v657_v26 = vpop.f32.mrb[4].mxu0 }
 0x146   :  { %2836 = vpow2.f32 %v727_v24  ;;  %v703_v27 = vadd.f32 %v692_v8, %v657_v26  ;;  %v659_v28 = vpop.f32.mrb[5].mxu0 }
 0x147   :  { %2838 = vpow2.f32 %v729_v25  ;;  %v704_v29 = vadd.f32 %v696_v9, %v659_v28  ;;  %v661_v30 = vpop.f32.mrb[6].mxu0 }
 0x148   :  { %v715_v31 = vsub.f32 0.0, %v703_v27  ;;  %v705_v32 = vadd.f32 %v692_v8, %v661_v30  ;;  %v663_v33 = vpop.f32.mrb[7].mxu0 }
 0x149   :  { %v716_v34 = vsub.f32 0.0, %v704_v29  ;;  %v706_v35 = vadd.f32 %v696_v9, %v663_v33 }
 0x14a   :  { %v731_v36 = vmul.f32 1.442695, %v715_v31  ;;  %v717_v37 = vsub.f32 0.0, %v705_v32 }
 0x14b   :  { %v733_v38 = vmul.f32 1.442695, %v716_v34  ;;  %v718_v39 = vsub.f32 0.0, %v706_v35 }
 0x14c   :  { %2840 = vpow2.f32 %v731_v36  ;;  %v735_v40 = vmul.f32 1.442695, %v717_v37  ;;  %v2727_v37 = vld [vmem:[%s3588_s5 + $0x4] ss:$8 sps:$4 sm:$0xff]  }
 0x14d   :  { %2842 = vpow2.f32 %v733_v38  ;;  %v737_v41 = vmul.f32 1.442695, %v718_v39  ;;  %v667_v42 = vpop.f32.mrb[8].mxu0  ;;  %v2722_v38 = vld [vmem:[%s3588_s5 + $0x110] ss:$8 sps:$4 sm:$0xff]  }
 0x14e   :  { %v2833_v43 = vpop.eup %2832  ;;  %2844 = vpow2.f32 %v735_v40  ;;  %v707_v44 = vadd.f32 %v692_v8, %v667_v42  ;;  %v669_v45 = vpop.f32.mrb[9].mxu0  ;;  %v2725_v39 = vld [vmem:[%s3588_s5] ss:$8 sps:$4 sm:$0xff]   ;;  %v2730_v40 = vld [vmem:[%s3588_s5 + $0x14] ss:$8 sps:$4 sm:$0xff]  }
 0x14f   :  { %v2835_v46 = vpop.eup %2834  ;;  %v747_v47 = vadd.f32 1.0, %v2833_v43  ;;  %2846 = vpow2.f32 %v737_v41  ;;  %v708_v48 = vadd.f32 %v696_v9, %v669_v45  ;;  %v671_v49 = vpop.f32.mrb[10].mxu0  ;;  %v2728_v41 = vld [vmem:[%s3588_s5 + $0x10] ss:$8 sps:$4 sm:$0xff]   ;;  %v2733_v42 = vld [vmem:[%s3588_s5 + $0x24] ss:$8 sps:$4 sm:$0xff]  }
 0x150   :  { %v2837_v50 = vpop.eup %2836  ;;  %v748_v51 = vadd.f32 1.0, %v2835_v46  ;;  %v719_v52 = vsub.f32 0.0, %v707_v44  ;;  %v709_v53 = vadd.f32 %v692_v8, %v671_v49  ;;  %v673_v54 = vpop.f32.mrb[11].mxu0  ;;  %v2723_v43 = vld [vmem:[%s3588_s5 + $0x120] ss:$8 sps:$4 sm:$0xff]  }
 0x151   :  { %v2839_v55 = vpop.eup %2838  ;;  %2848 = vrcp.f32 %v747_v47  ;;  %v749_v56 = vadd.f32 1.0, %v2837_v50  ;;  %v720_v57 = vsub.f32 0.0, %v708_v48  ;;  %v710_v58 = vadd.f32 %v696_v9, %v673_v54  ;;  %v2731_v44 = vld [vmem:[%s3588_s5 + $0x20] ss:$8 sps:$4 sm:$0xff]   ;;  %v2736_v45 = vld [vmem:[%s3588_s5 + $0x34] ss:$8 sps:$4 sm:$0xff]  }
 0x152   :  { %2850 = vrcp.f32 %v748_v51  ;;  %v750_v59 = vadd.f32 1.0, %v2839_v55  ;;  %v739_v60 = vmul.f32 1.442695, %v719_v52  ;;  %v721_v61 = vsub.f32 0.0, %v709_v53  ;;  %v2734_v46 = vld [vmem:[%s3588_s5 + $0x30] ss:$8 sps:$4 sm:$0xff]  }
 0x153   :  { %2852 = vrcp.f32 %v749_v56  ;;  %v741_v62 = vmul.f32 1.442695, %v720_v57  ;;  %v722_v63 = vsub.f32 0.0, %v710_v58  ;;  %v2724_v47 = vld [vmem:[%s3588_s5 + $0x130] ss:$8 sps:$4 sm:$0xff]  }
 0x154   :  { %2854 = vrcp.f32 %v750_v59  ;;  %v743_v0 = vmul.f32 1.442695, %v721_v61  ;;  %v2739_v48 = vld [vmem:[%s3588_s5 + $0x44] ss:$8 sps:$4 sm:$0xff]   ;;  %v2737_v49 = vld [vmem:[%s3588_s5 + $0x40] ss:$8 sps:$4 sm:$0xff]  }
 0x155   :  { %2856 = vpow2.f32 %v739_v60  ;;  %v745_v1 = vmul.f32 1.442695, %v722_v63  ;;  %v2742_v50 = vld [vmem:[%s3588_s5 + $0x54] ss:$8 sps:$4 sm:$0xff]   ;;  %v2740_v51 = vld [vmem:[%s3588_s5 + $0x50] ss:$8 sps:$4 sm:$0xff]  }
 0x156   :  { %v2841_v3 = vpop.eup %2840  ;;  %2858 = vpow2.f32 %v741_v62  ;;  %v2745_v52 = vld [vmem:[%s3588_s5 + $0x64] ss:$8 sps:$4 sm:$0xff]   ;;  %v2743_v53 = vld [vmem:[%s3588_s5 + $0x60] ss:$8 sps:$4 sm:$0xff]   ;;  %v2746_v54 = vld [vmem:[%s3588_s5 + $0x70] ss:$8 sps:$4 sm:$0xff]  }
 0x157   :  { %v2843_v4 = vpop.eup %2842  ;;  %v751_v5 = vadd.f32 1.0, %v2841_v3  ;;  %2860 = vpow2.f32 %v743_v0  ;;  %v2748_v55 = vld [vmem:[%s3588_s5 + $0x74] ss:$8 sps:$4 sm:$0xff]   ;;  %v2751_v56 = vld [vmem:[%s3588_s5 + $0x84] ss:$8 sps:$4 sm:$0xff]  }
 0x158   :  { %v2845_v6 = vpop.eup %2844  ;;  %v752_v7 = vadd.f32 1.0, %v2843_v4  ;;  %2862 = vpow2.f32 %v745_v1  ;;  %v2749_v57 = vld [vmem:[%s3588_s5 + $0x80] ss:$8 sps:$4 sm:$0xff]  }
 0x159   :  { %v2847_v8 = vpop.eup %2846  ;;  %2864 = vrcp.f32 %v751_v5  ;;  %v753_v9 = vadd.f32 1.0, %v2845_v6 }
 0x15a   :  { %2866 = vrcp.f32 %v752_v7  ;;  %v754_v10 = vadd.f32 1.0, %v2847_v8 }
 0x15b   :  { %v2849_v11 = vpop.eup %2848  ;;  %2868 = vrcp.f32 %v753_v9 }
 0x15c   :  { %v2851_v12 = vpop.eup %2850  ;;  %2870 = vrcp.f32 %v754_v10 }
 0x15d   :  { %v2853_v13 = vpop.eup %2852 }
 0x15e   :  { %v2855_v14 = vpop.eup %2854  ;;  %v771_v15 = vpack.c.bf16 %v2853_v13, %v2849_v11 }
 0x15f   :  { %v2857_v16 = vpop.eup %2856  ;;  %v772_v17 = vpack.c.bf16 %v2855_v14, %v2851_v12 }
 0x160   :  { %v2859_v18 = vpop.eup %2858  ;;  %v755_v19 = vadd.f32 1.0, %v2857_v16 }
 0x161   :  { %v2861_v20 = vpop.eup %2860  ;;  %v756_v21 = vadd.f32 1.0, %v2859_v18  ;;  %802 = vmatprep.subr.bf16.mxu1 %v772_v17  ;;  %v2752_v17 = vld [vmem:[%s3585_s2 + $0x24] sm:$0xff]   ;;  %v2925_v18 = vmov 0.0  }
 0x162   :  { %v2863_v22 = vpop.eup %2862  ;;  %2872 = vrcp.f32 %v755_v19  ;;  %v757_v23 = vadd.f32 1.0, %v2861_v20  ;;  %803 = vmatpush1.bf16.msra.mxu1 %v771_v15  ;;  %2522 = vmatprep.subr.bf16.mxu0 %v2925_v18  ;;  %v2753_v19 = vld [vmem:[%s3585_s2 + $0x6c] sm:$0xff]  }
 0x163   :  { %v2865_v24 = vpop.eup %2864  ;;  %2874 = vrcp.f32 %v756_v21  ;;  %v758_v25 = vadd.f32 1.0, %v2863_v22  ;;  %2523 = vmatpush3.bf16.msra.mxu0 %v2753_v19  ;;  %v2754_v20 = vld [vmem:[%s3585_s2 + $0x2c] sm:$0xff]   ;;  %v2755_v21 = vld [vmem:[%s3585_s2 + $0x74] sm:$0xff]   ;;  %2532 = vmatprep.mubr.msk.bf16.mxu0 %vm2926_vm5, %v2925_v18 }
 0x164   :  { %v2867_v26 = vpop.eup %2866  ;;  %2876 = vrcp.f32 %v757_v23  ;;  %2524 = vmatprep.subr.bf16.mxu0 %v2925_v18  ;;  %v2756_v22 = vld [vmem:[%s3585_s2 + $0x34] sm:$0xff]   ;;  %v2757_v23 = vld [vmem:[%s3585_s2 + $0x7c] sm:$0xff]  }
 0x165   :  { %v2869_v27 = vpop.eup %2868  ;;  %2878 = vrcp.f32 %v758_v25  ;;  %v2759_v25 = vld [vmem:[%s3585_s2 + $0x84] sm:$0xff]   ;;  %v2790_v19 = vld [vmem:[%s3588_s5 + $0xd0] ss:$8 sps:$4 sm:$0xff]  }
 0x166   :  { %v2871_v28 = vpop.eup %2870  ;;  %v773_v29 = vpack.c.bf16 %v2869_v27, %v2865_v24  ;;  %v2758_v24 = vld [vmem:[%s3585_s2 + $0x3c] sm:$0xff]   ;;  %v2761_v27 = vld [vmem:[%s3585_s2 + $0x8c] ss:$0 sps:$4 sm:$0xff]  }
 0x167   :  { %v774_v30 = vpack.c.bf16 %v2871_v28, %v2867_v26  ;;  %2525 = vmatpush3.bf16.msra.mxu0 %v2755_v21  ;;  %v2760_v26 = vld [vmem:[%s3585_s2 + $0x44] ss:$0 sps:$4 sm:$0xff]   ;;  %v2793_v21 = vld [vmem:[%s3588_s5 + $0xe0] ss:$8 sps:$4 sm:$0xff]  }
 0x168   :  { %2526 = vmatprep.subr.bf16.mxu0 %v2925_v18  ;;  %v1087_v28 = vsel %vm1085_vm4, %v2760_v26, 0 }
 0x169   :  { %804 = vmatprep.subr.bf16.mxu1 %v774_v30 }
 0x16a   :  { %805 = vmatpush1.bf16.msra.mxu1 %v773_v29  ;;  %v1337_v29 = vsel %vm1085_vm4, %v2761_v27, 0 }
 0x16b   :  { %2527 = vmatpush3.bf16.msra.mxu0 %v2757_v23  ;;  %v2796_v23 = vld [vmem:[%s3588_s5 + $0xf0] ss:$8 sps:$4 sm:$0xff]  }
 0x16c   :  { %v2873_v31 = vpop.eup %2872  ;;  %2528 = vmatprep.subr.bf16.mxu0 %v2925_v18 }
 0x16d   :  { %v2875_v32 = vpop.eup %2874 }
 0x16e   :  { %v2877_v33 = vpop.eup %2876 }
 0x16f   :  { %v2879_v34 = vpop.eup %2878  ;;  %v775_v35 = vpack.c.bf16 %v2877_v33, %v2873_v31  ;;  %2529 = vmatpush3.bf16.msra.mxu0 %v2759_v25 }
 0x170   :  { %v776_v36 = vpack.c.bf16 %v2879_v34, %v2875_v32  ;;  %2530 = vmatprep.subr.bf16.mxu0 %v2925_v18 }
 0x172   :  { %806 = vmatprep.subr.bf16.mxu1 %v776_v36 }
 0x173   :  { %807 = vmatpush1.bf16.msra.mxu1 %v775_v35  ;;  %2531 = vmatpush3.bf16.msra.mxu0 %v1337_v29 }
 0x174   :  { %972 = vmatprep.subr.bf16.mxu1 %v2727_v37  ;;  %2550 = vmatprep.subr.bf16.mxu0 %v2925_v18 }
 0x176   :  { %2245 = vmatmul.mubr.msk.bf16.vlgmr.msra.gmra.mrb[0].mxu1 %vm792_vm2, %v2722_v38 }
 0x177   :  { %844 = vmatprep.mubr.bf16.mxu1 %v2924_v2  ;;  %973 = vmatpush1.bf16.msra.mxu1 %v2725_v39 }
 0x178   :  { %974 = vmatprep.subr.bf16.mxu1 %v2730_v40 }
 0x17b   :  { %975 = vmatpush1.bf16.msra.mxu1 %v2728_v41 }
 0x17c   :  { %976 = vmatprep.subr.bf16.mxu1 %v2733_v42  ;;  %v2762_v42 = vld [vmem:[%s3585_s2] sm:$0xff]  }
 0x17e   :  { %2246 = vmatmul.mubr.msk.bf16.gmra.mrb[4].mxu1 %vm792_vm2, %v2723_v43 }
 0x17f   :  { %854 = vmatprep.mubr.bf16.mxu1 %v2924_v2  ;;  %977 = vmatpush1.bf16.msra.mxu1 %v2731_v44 }
 0x180   :  { %978 = vmatprep.subr.bf16.mxu1 %v2736_v45 }
 0x183   :  { %979 = vmatpush1.bf16.msra.mxu1 %v2734_v46 }
 0x184   :  { %980 = vmatprep.subr.bf16.mxu1 %v2739_v48  ;;  %v2763_v48 = vld [vmem:[%s3585_s2 + $0x8] sm:$0xff]  }
 0x186   :  { %2247 = vmatmul.mubr.msk.bf16.gmra.mrb[8].mxu1 %vm792_vm2, %v2724_v47 }
 0x187   :  { %981 = vmatpush1.bf16.msra.mxu1 %v2737_v49  ;;  %v2764_v49 = vld [vmem:[%s3585_s2 + $0x10] sm:$0xff]  }
 0x188   :  { %982 = vmatprep.subr.bf16.mxu1 %v2742_v50  ;;  %v2765_v50 = vld [vmem:[%s3585_s2 + $0x18] sm:$0xff]  }
 0x18b   :  { %983 = vmatpush1.bf16.msra.mxu1 %v2740_v51  ;;  %v2766_v51 = vld [vmem:[%s3585_s2 + $0x20] ss:$0 sps:$4 sm:$0xff]  }
 0x18c   :  { %984 = vmatprep.subr.bf16.mxu1 %v2745_v52  ;;  %v1161_v52 = vsel %vm1085_vm4, %v2766_v51, 0 }
 0x18f   :  { %985 = vmatpush1.bf16.msra.mxu1 %v2743_v53 }
 0x190   :  { %986 = vmatprep.subr.bf16.mxu1 %v2748_v55  ;;  %v2767_v55 = vld [vmem:[%s3585_s2 + $0x48] sm:$0xff]  }
 0x193   :  { %987 = vmatpush1.bf16.msra.mxu1 %v2746_v54 }
 0x194   :  { %988 = vmatprep.subr.bf16.mxu1 %v2751_v56 }
 0x197   :  { %989 = vmatpush1.bf16.msra.mxu1 %v2749_v57  ;;  %v2768_v57 = vld [vmem:[%s3585_s2 + $0x50] sm:$0xff]  }
 0x198   :  { %2480 = vmatprep.subr.bf16.mxu1 %v2925_v18 }
 0x249   :  { %v836_v58 = vpop.f32.mrb[0].mxu1 }
 0x24a   :  { %v838_v59 = vpop.f32.mrb[1].mxu1 }
 0x24b   :  { %v840_v60 = vpop.f32.mrb[2].mxu1 }
 0x24c   :  { %v842_v61 = vpop.f32.mrb[3].mxu1 }
 0x251   :  { %v846_v62 = vpop.f32.mrb[4].mxu1 }
 0x252   :  { %v848_v63 = vpop.f32.mrb[5].mxu1 }
 0x253   :  { %v850_v0 = vpop.f32.mrb[6].mxu1 }
 0x254   :  { %v865_v1 = vmax.f32 %v836_v58, %v850_v0  ;;  %v852_v3 = vpop.f32.mrb[7].mxu1  ;;  %v2769_v58 = vld [vmem:[%s3585_s2 + $0x58] sm:$0xff]   ;;  %v2772_v0 = vld [vmem:[%s3585_s2 + $0x90] sm:$0xff]  }
 0x255   :  { %v866_v4 = vmax.f32 %v838_v59, %v852_v3  ;;  %v2770_v59 = vld [vmem:[%s3585_s2 + $0x60] sm:$0xff]   ;;  %v2773_v3 = vld [vmem:[%s3585_s2 + $0x98] sm:$0xff]  }
 0x259   :  { %v856_v5 = vpop.f32.mrb[8].mxu1 }
 0x25a   :  { %v867_v6 = vmax.f32 %v840_v60, %v856_v5  ;;  %v858_v7 = vpop.f32.mrb[9].mxu1  ;;  %v2771_v60 = vld [vmem:[%s3585_s2 + $0x68] ss:$0 sps:$4 sm:$0xff]  }
 0x25b   :  { %v868_v8 = vmax.f32 %v842_v61, %v858_v7  ;;  %v860_v9 = vpop.f32.mrb[10].mxu1  ;;  %v1248_v61 = vsel %vm1085_vm4, %v2771_v60, 0  ;;  %v2775_v5 = vld [vmem:[%s3585_s2 + $0xa8] sm:$0xff]  }
 0x25c   :  { %v871_v10 = vpack.c.bf16 %v867_v6, %v865_v1  ;;  %v869_v11 = vmax.f32 %v846_v62, %v860_v9  ;;  %v862_v12 = vpop.f32.mrb[11].mxu1  ;;  %v2776_v6 = vld [vmem:[%s3585_s2 + $0xb0] ss:$0 sps:$4 sm:$0xff]  }
 0x25d   :  { %v872_v13 = vpack.c.bf16 %v868_v8, %v866_v4  ;;  %v870_v14 = vmax.f32 %v848_v63, %v862_v12  ;;  %v2774_v4 = vld [vmem:[%s3585_s2 + $0xa0] sm:$0xff]   ;;  %v1426_v7 = vsel %vm1085_vm4, %v2776_v6, 0 }
 0x25e   :  { %v873_v16 = vpack.c.bf16 %v869_v11, %v869_v11  ;;  %v2780_v11 = vld [vmem:[%s3588_s5 + $0x94] ss:$8 sps:$4 sm:$0xff]   ;;  %v2783_v12 = vld [vmem:[%s3588_s5 + $0xa4] ss:$8 sps:$4 sm:$0xff]  }
 0x25f   :  { %v874_v15 = vpack.c.bf16 %v870_v14, %v870_v14  ;;  %2266 = vmatprep.mubr.msk.bf16.mxu1 %vm965_vm3, %v872_v13  ;;  %v2781_v13 = vld [vmem:[%s3588_s5 + $0xa0] ss:$8 sps:$4 sm:$0xff]   ;;  %v2784_v14 = vld [vmem:[%s3588_s5 + $0xb0] ss:$8 sps:$4 sm:$0xff]  }
 0x260   :  { %1005 = vmatmul.mubr.bf16.vlgmr.msra.gmra.mrb[12].mxu1 %v871_v10  ;;  %v2778_v10 = vld [vmem:[%s3588_s5 + $0x90] ss:$8 sps:$4 sm:$0xff]   ;;  %v2802_v6 = vld [vmem:[%s3586_s3 + $0x20] sm:$0xff]  }
 0x261   :  { %2267 = vmatprep.mubr.msk.bf16.mxu1 %vm965_vm3, %v874_v15  ;;  %2481 = vmatpush3.bf16.msra.mxu1 %v2752_v17  ;;  %v2789_v15 = vld [vmem:[%s3588_s5 + $0xc4] ss:$8 sps:$4 sm:$0xff]   ;;  %v2792_v17 = vld [vmem:[%s3588_s5 + $0xd4] ss:$8 sps:$4 sm:$0xff]  }
 0x262   :  { %2482 = vmatprep.subr.bf16.mxu1 %v2925_v18 }
 0x265   :  { %2483 = vmatpush3.bf16.msra.mxu1 %v2754_v20  ;;  %v2795_v20 = vld [vmem:[%s3588_s5 + $0xe4] ss:$8 sps:$4 sm:$0xff]  }
 0x266   :  { %2484 = vmatprep.subr.bf16.mxu1 %v2925_v18 }
 0x268   :  { %1015 = vmatmul.mubr.bf16.gmra.mrb[16].mxu1 %v873_v16  ;;  %v2787_v16 = vld [vmem:[%s3588_s5 + $0xc0] ss:$8 sps:$4 sm:$0xff]  }
 0x269   :  { %2485 = vmatpush3.bf16.msra.mxu1 %v2756_v22  ;;  %2490 = vmatprep.mubr.msk.bf16.mxu1 %vm2926_vm5, %v2925_v18  ;;  %v2798_v22 = vld [vmem:[%s3588_s5 + $0xf4] ss:$8 sps:$4 sm:$0xff]  }
 0x26a   :  { %2486 = vmatprep.subr.bf16.mxu1 %v2925_v18 }
 0x26d   :  { %2487 = vmatpush3.bf16.msra.mxu1 %v2758_v24 }
 0x26e   :  { %2488 = vmatprep.subr.bf16.mxu1 %v2925_v18 }
 0x271   :  { %2489 = vmatpush3.bf16.msra.mxu1 %v1087_v28 }
 0x272   :  { %2494 = vmatprep.subr.bf16.mxu1 %v2925_v18 }
 0x333   :  { %v1006_v30 = vpop.f32.mrb[12].mxu1 }
 0x334   :  { %v1008_v31 = vpop.f32.mrb[13].mxu1 }
 0x335   :  { %v1023_v32 = vmax.f32 %v1006_v30, %v1008_v31  ;;  %v1010_v33 = vpop.f32.mrb[14].mxu1 }
 0x336   :  { %v1012_v34 = vpop.f32.mrb[15].mxu1 }
 0x337   :  { %1027 = vst.msk [vmem:[#allocation2] sm:$0xff] %vm1026_vm6, %v1023_v32  ;;  %v1024_v35 = vmax.f32 %v1010_v33, %v1012_v34 }
 0x339   :  { %1028 = vst.msk [vmem:[#allocation2 + $0x8] sm:$0xff] %vm1026_vm6, %v1024_v35 }
 0x33b   :  { %v1016_v36 = vpop.f32.mrb[16].mxu1 }
 0x33c   :  { %v1018_v37 = vpop.f32.mrb[17].mxu1 }
 0x33d   :  { %v1025_v38 = vmax.f32 %v1016_v36, %v1018_v37  ;;  %v1020_v39 = vpop.f32.mrb[18].mxu1 }
 0x33e   :  { %v1021_v40 = vpop.f32.mrb[19].mxu1  ;;  %v1030_v54 = vld [vmem:[#allocation2] sm:$0xff] }
 0x33f   :  { %1029 = vst.msk [vmem:[#allocation2 + $0x10] sm:$0xff] %vm1026_vm6, %v1025_v38 }
 0x340   :  { %v1042_v41 = vld [vmem:[#allocation2 + $0x2] sm:$0xff] }
 0x341   :  { %v1293_v44 = vld [vmem:[#allocation2 + $0x6] sm:$0xff] }
 0x342   :  { %v1031_v53 = vld [vmem:[#allocation2 + $0x8] sm:$0xff] }
 0x343   :  { %v1041_v56 = vpack.c.bf16 %v1031_v53, %v1030_v54  ;;  %v1204_v63 = vld [vmem:[#allocation2 + $0x4] sm:$0xff] }
 0x346   :  { %v1043_v43 = vld [vmem:[#allocation2 + $0xa] sm:$0xff] }
 0x347   :  { %v1294_v45 = vld [vmem:[#allocation2 + $0xe] sm:$0xff]  ;;  %v1054_v46 = vpack.c.bf16 %v1043_v43, %v1042_v41 }
 0x348   :  { %v1305_v47 = vpack.c.bf16 %v1294_v45, %v1293_v44  ;;  %v1205_v62 = vld [vmem:[#allocation2 + $0xc] sm:$0xff] }
 0x349   :  { %2491 = vmatmul.mubr.msk.bf16.vlgmr.msra.gmra.mrb[20].mxu1 %vm1026_vm6, %v1054_v46  ;;  %v1216_v1 = vpack.c.bf16 %v1205_v62, %v1204_v63  ;;  %v1383_v8 = vld [vmem:[#allocation2 + $0x10] sm:$0xff]  ;;  %v71_v46 = vld [vmem:[%s3589_s6 + $0x1] ss:$0 sm:$0xff] }
 0x34a   :  { %2533 = vmatmul.mubr.msk.bf16.vlgmr.msra.gmra.mrb[12].mxu0 %vm1026_vm6, %v1305_v47  ;;  %2495 = vmatpush3.bf16.msra.mxu1 %v2762_v42  ;;  %v1394_v9 = vpack.c.bf16 %v1383_v8, %v1031_v53 }
 0x34b   :  { %2504 = vmatprep.mubr.msk.bf16.mxu1 %vm2926_vm5, %v2925_v18  ;;  %2496 = vmatprep.subr.bf16.mxu1 %v2925_v18 }
 0x34c   :  { %2552 = vmatprep.mubr.msk.bf16.mxu0 %vm2926_vm5, %v2925_v18 }
 0x34e   :  { %2497 = vmatpush3.bf16.msra.mxu1 %v2763_v48 }
 0x34f   :  { %2498 = vmatprep.subr.bf16.mxu1 %v2925_v18 }
 0x352   :  { %2499 = vmatpush3.bf16.msra.mxu1 %v2764_v49 }
 0x353   :  { %2500 = vmatprep.subr.bf16.mxu1 %v2925_v18 }
 0x356   :  { %2501 = vmatpush3.bf16.msra.mxu1 %v2765_v50 }
 0x357   :  { %2502 = vmatprep.subr.bf16.mxu1 %v2925_v18 }
 0x35a   :  { %2503 = vmatpush3.bf16.msra.mxu1 %v1161_v52 }
 0x35b   :  { %2508 = vmatprep.subr.bf16.mxu1 %v2925_v18 }
 0x35d   :  { %2505 = vmatmul.mubr.msk.bf16.vlgmr.msra.gmra.mrb[24].mxu1 %vm1026_vm6, %v1041_v56 }
 0x35e   :  { %2509 = vmatpush3.bf16.msra.mxu1 %v2767_v55  ;;  %2518 = vmatprep.mubr.msk.bf16.mxu1 %vm2926_vm5, %v2925_v18 }
 0x35f   :  { %2510 = vmatprep.subr.bf16.mxu1 %v2925_v18 }
 0x362   :  { %2511 = vmatpush3.bf16.msra.mxu1 %v2768_v57 }
 0x363   :  { %2512 = vmatprep.subr.bf16.mxu1 %v2925_v18 }
 0x366   :  { %2513 = vmatpush3.bf16.msra.mxu1 %v2769_v58 }
 0x367   :  { %2514 = vmatprep.subr.bf16.mxu1 %v2925_v18 }
 0x36a   :  { %2515 = vmatpush3.bf16.msra.mxu1 %v2770_v59 }
 0x36b   :  { %2516 = vmatprep.subr.bf16.mxu1 %v2925_v18 }
 0x36e   :  { %2517 = vmatpush3.bf16.msra.mxu1 %v1248_v61 }
 0x36f   :  { %2536 = vmatprep.subr.bf16.mxu1 %v2925_v18 }
 0x371   :  { %2519 = vmatmul.mubr.msk.bf16.vlgmr.msra.gmra.mrb[28].mxu1 %vm1026_vm6, %v1216_v1 }
 0x372   :  { %2537 = vmatpush3.bf16.msra.mxu1 %v2772_v0  ;;  %2546 = vmatprep.mubr.msk.bf16.mxu1 %vm2926_vm5, %v2925_v18 }
 0x373   :  { %2538 = vmatprep.subr.bf16.mxu1 %v2925_v18 }
 0x376   :  { %2539 = vmatpush3.bf16.msra.mxu1 %v2773_v3  ;;  %v2777_v3 = vld [vmem:[%s3588_s5 + $0x140] ss:$8 sps:$4 sm:$0xff]  }
 0x377   :  { %2540 = vmatprep.subr.bf16.mxu1 %v2925_v18 }
 0x37a   :  { %2541 = vmatpush3.bf16.msra.mxu1 %v2774_v4  ;;  %v2801_v4 = vld [vmem:[%s3588_s5 + $0x104] ss:$8 sps:$4 sm:$0xff]  }
 0x37b   :  { %2542 = vmatprep.subr.bf16.mxu1 %v2925_v18 }
 0x37e   :  { %2543 = vmatpush3.bf16.msra.mxu1 %v2775_v5  ;;  %v2799_v5 = vld [vmem:[%s3588_s5 + $0x100] ss:$8 sps:$4 sm:$0xff]  }
 0x37f   :  { %2544 = vmatprep.subr.bf16.mxu1 %v2925_v18 }
 0x382   :  { %2545 = vmatpush3.bf16.msra.mxu1 %v1426_v7 }
 0x383   :  { %1615 = vmatprep.subr.bf16.mxu1 %v2780_v11 }
 0x385   :  { %2547 = vmatmul.mubr.msk.bf16.vlgmr.msra.gmra.mrb[32].mxu1 %vm1026_vm6, %v1394_v9 }
 0x386   :  { %1647 = vmatprep.mubr.bf16.mxu1 %v2924_v2  ;;  %1616 = vmatpush1.bf16.msra.mxu1 %v2778_v10  ;;  %v2786_v2 = vld [vmem:[%s3588_s5 + $0xb4] ss:$8 sps:$4 sm:$0xff]  }
 0x387   :  { %1617 = vmatprep.subr.bf16.mxu1 %v2783_v12  ;;  %v2803_v12 = vld [vmem:[%s3586_s3 + $0x40] sm:$0xff]  }
 0x38a   :  { %1618 = vmatpush1.bf16.msra.mxu1 %v2781_v13 }
 0x38b   :  { %1619 = vmatprep.subr.bf16.mxu1 %v2786_v2  ;;  %v2804_v2 = vld [vmem:[%s3586_s3 + $0x28] sm:$0xff]  }
 0x38e   :  { %1620 = vmatpush1.bf16.msra.mxu1 %v2784_v14  ;;  %v2805_v14 = vld [vmem:[%s3586_s3 + $0x48] sm:$0xff]  }
 0x38f   :  { %1621 = vmatprep.subr.bf16.mxu1 %v2789_v15  ;;  %v2806_v15 = vld [vmem:[%s3586_s3 + $0x30] sm:$0xff]  }
 0x392   :  { %1622 = vmatpush1.bf16.msra.mxu1 %v2787_v16  ;;  %v2807_v16 = vld [vmem:[%s3586_s3 + $0x50] sm:$0xff]  }
 0x393   :  { %1623 = vmatprep.subr.bf16.mxu1 %v2792_v17  ;;  %v2808_v17 = vld [vmem:[%s3586_s3 + $0x38] sm:$0xff]  }
 0x396   :  { %1624 = vmatpush1.bf16.msra.mxu1 %v2790_v19  ;;  %v2809_v19 = vld [vmem:[%s3586_s3 + $0x58] sm:$0xff]  }
 0x397   :  { %1625 = vmatprep.subr.bf16.mxu1 %v2795_v20 }
 0x39a   :  { %1626 = vmatpush1.bf16.msra.mxu1 %v2793_v21 }
 0x39b   :  { %1627 = vmatprep.subr.bf16.mxu1 %v2798_v22 }
 0x39e   :  { %1628 = vmatpush1.bf16.msra.mxu1 %v2796_v23 }
 0x39f   :  { %1629 = vmatprep.subr.bf16.mxu1 %v2801_v4 }
 0x3a2   :  { %1630 = vmatpush1.bf16.msra.mxu1 %v2799_v5 }
 0x3a3   :  { %2580 = vmatprep.subr.bf16.mxu1 %v2925_v18 }
 0x41c   :  { %v1123_v24 = vpop.f32.mrb[20].mxu1 }
 0x41d   :  { %v1373_v25 = vpop.f32.mrb[12].mxu0  ;;  %v2492_v26 = vpop.f32.mrb[21].mxu1 }
 0x41e   :  { %v2534_v27 = vpop.f32.mrb[13].mxu0  ;;  %v1126_v28 = vpop.f32.mrb[22].mxu1  ;;  %v2810_v26 = vld [vmem:[%s3586_s3] sm:$0xff]  }
 0x41f   :  { %v1376_v29 = vpop.f32.mrb[14].mxu0  ;;  %v2493_v30 = vpop.f32.mrb[23].mxu1 }
 0x420   :  { %v2535_v31 = vpop.f32.mrb[15].mxu0  ;;  %v2811_v30 = vld [vmem:[%s3586_s3 + $0x8] sm:$0xff]  }
 0x421   :  { %v2812_v31 = vld [vmem:[%s3586_s3 + $0x10] sm:$0xff]  }
 0x430   :  { %v1197_v32 = vpop.f32.mrb[24].mxu1 }
 0x431   :  { %v1198_v33 = vadd.f32 %v1197_v32, %v1123_v24  ;;  %v2506_v34 = vpop.f32.mrb[25].mxu1  ;;  %v2813_v32 = vld [vmem:[%s3586_s3 + $0x18] sm:$0xff]  }
 0x432   :  { %v1200_v35 = vpop.f32.mrb[26].mxu1  ;;  %v2814_v34 = vld [vmem:[%s3586_s3 + $0x60] sm:$0xff]  }
 0x433   :  { %v1201_v36 = vadd.f32 %v1200_v35, %v1126_v28  ;;  %v2507_v37 = vpop.f32.mrb[27].mxu1 }
 0x434   :  { %v2816_v37 = vld [vmem:[%s3586_s3 + $0x70] sm:$0xff]  }
 0x444   :  { %v1284_v38 = vpop.f32.mrb[28].mxu1 }
 0x445   :  { %v1291_v39 = vadd.f32 %v1284_v38, %v1198_v33  ;;  %v2520_v40 = vpop.f32.mrb[29].mxu1  ;;  %v2817_v38 = vld [vmem:[%s3586_s3 + $0x78] sm:$0xff]  }
 0x446   :  { %v1287_v41 = vpop.f32.mrb[30].mxu1 }
 0x447   :  { %v1292_v42 = vadd.f32 %v1287_v41, %v1201_v36  ;;  %v2521_v43 = vpop.f32.mrb[31].mxu1  ;;  %v1380_v44 = vadd.f32 %v1373_v25, %v1291_v39  ;;  %v2815_v36 = vld [vmem:[%s3586_s3 + $0x68] sm:$0xff]   ;;  %v2818_v41 = vld [vmem:[%s3587_s4] sm:$0xff]  }
 0x448   :  { %v2820_v43 = vld [vmem:[%s3587_s4 + $0x10] sm:$0xff]  }
 0x449   :  { %v1381_v45 = vadd.f32 %v1376_v29, %v1292_v42  ;;  %v2819_v42 = vld [vmem:[%s3587_s4 + $0x8] sm:$0xff]  }
 0x458   :  { %v1462_v47 = vpop.f32.mrb[32].mxu1 }
 0x459   :  { %v1469_v48 = vadd.f32 %v1462_v47, %v1380_v44  ;;  %v2548_v49 = vpop.f32.mrb[33].mxu1  ;;  %v2821_v44 = vld [vmem:[%s3587_s4 + $0x18] sm:$0xff]   ;;  %v2824_v47 = vld [vmem:[%s3587_s4 + $0x30] sm:$0xff]  }
 0x45a   :  { %v1465_v50 = vpop.f32.mrb[34].mxu1 }
 0x45b   :  { %v1471_v51 = vadd.f32 %v1469_v48, %v71_v46  ;;  %v1470_v52 = vadd.f32 %v1465_v50, %v1381_v45  ;;  %v2549_v53 = vpop.f32.mrb[35].mxu1  ;;  %v2822_v45 = vld [vmem:[%s3587_s4 + $0x20] sm:$0xff]   ;;  %v2825_v48 = vld [vmem:[%s3587_s4 + $0x38] ss:$0 sps:$4 sm:$0xff]  }
 0x45c   :  { %v2029_v49 = vsel %vm1085_vm4, %v2825_v48, 0 }
 0x45d   :  { %v1473_v54 = vsub.f32 0.0, %v1471_v51  ;;  %v1472_v55 = vadd.f32 %v1470_v52, %v71_v46  ;;  %v2823_v46 = vld [vmem:[%s3587_s4 + $0x28] sm:$0xff]  }
 0x45f   :  { %v1475_v56 = vmul.f32 1.442695, %v1473_v54  ;;  %v1474_v57 = vsub.f32 0.0, %v1472_v55 }
 0x461   :  { %2880 = vpow2.f32 %v1475_v56  ;;  %v1477_v58 = vmul.f32 1.442695, %v1474_v57 }
 0x463   :  { %2882 = vpow2.f32 %v1477_v58 }
 0x46b   :  { %v2881_v59 = vpop.eup %2880 }
 0x46c   :  { %v1479_v60 = vadd.f32 1.0, %v2881_v59 }
 0x46d   :  { %v2883_v61 = vpop.eup %2882 }
 0x46e   :  { %v1480_v62 = vadd.f32 1.0, %v2883_v61  ;;  %2884 = vrcp.f32 %v1479_v60 }
 0x470   :  { %2886 = vrcp.f32 %v1480_v62 }
 0x478   :  { %v2885_v63 = vpop.eup %2884 }
 0x47a   :  { %v2887_v0 = vpop.eup %2886 }
 0x47b   :  { %v1483_v1 = vpack.c.bf16 %v2887_v0, %v2885_v63  ;;  %v72_v0 = vld [vmem:[%s3589_s6 + $0x2] ss:$0 sm:$0xff] }
 0x47d   :  { %2551 = vmatpush3.bf16.msra.mxu0 %v1483_v1 }
 0x47e   :  { %2556 = vmatprep.subr.bf16.mxu0 %v2925_v18 }
 0x480   :  { %2553 = vmatmul.mubr.msk.bf16.vlgmr.msra.gmra.mrb[16].mxu0 %vm965_vm3, %v2777_v3 }
 0x481   :  { %2564 = vmatprep.mubr.msk.bf16.mxu0 %vm2926_vm5, %v2925_v18  ;;  %2557 = vmatpush3.bf16.msra.mxu0 %v2802_v6 }
 0x482   :  { %2558 = vmatprep.subr.bf16.mxu0 %v2925_v18 }
 0x485   :  { %2559 = vmatpush3.bf16.msra.mxu0 %v2804_v2  ;;  %v2826_v2 = vld [vmem:[%s3587_s4 + $0x40] sm:$0xff]  }
 0x486   :  { %2560 = vmatprep.subr.bf16.mxu0 %v2925_v18 }
 0x489   :  { %2561 = vmatpush3.bf16.msra.mxu0 %v2806_v15  ;;  %v2828_v15 = vld [vmem:[%s3587_s4 + $0x50] sm:$0xff]  }
 0x48a   :  { %2562 = vmatprep.subr.bf16.mxu0 %v2925_v18 }
 0x48d   :  { %2563 = vmatpush3.bf16.msra.mxu0 %v2808_v17  ;;  %v2830_v17 = vld [vmem:[%s3587_s4 + $0x60] sm:$0xff]  }
 0x48e   :  { %2568 = vmatprep.subr.bf16.mxu0 %v2925_v18 }
 0x553   :  { %v1526_v7 = vpop.f32.mrb[16].mxu0 }
 0x554   :  { %v2554_v8 = vpop.f32.mrb[17].mxu0 }
 0x555   :  { %v1529_v9 = vpop.f32.mrb[18].mxu0 }
 0x556   :  { %v1533_v10 = vmax.f32 %v1526_v7, %v1529_v9  ;;  %v2555_v11 = vpop.f32.mrb[19].mxu0 }
 0x558   :  { %v1534_v13 = vpack.c.bf16 %v1533_v10, %v1533_v10 }
 0x55a   :  { %1648 = vmatmul.mubr.bf16.vlgmr.msra.gmra.mrb[36].mxu1 %v1534_v13 }
 0x55b   :  { %2581 = vmatpush3.bf16.msra.mxu1 %v2803_v12  ;;  %2588 = vmatprep.mubr.msk.bf16.mxu1 %vm2926_vm5, %v2925_v18 }
 0x55c   :  { %2582 = vmatprep.subr.bf16.mxu1 %v2925_v18 }
 0x55f   :  { %2583 = vmatpush3.bf16.msra.mxu1 %v2805_v14  ;;  %v2827_v14 = vld [vmem:[%s3587_s4 + $0x48] sm:$0xff]  }
 0x560   :  { %2584 = vmatprep.subr.bf16.mxu1 %v2925_v18 }
 0x563   :  { %2585 = vmatpush3.bf16.msra.mxu1 %v2807_v16  ;;  %v2829_v16 = vld [vmem:[%s3587_s4 + $0x58] sm:$0xff]  }
 0x564   :  { %2586 = vmatprep.subr.bf16.mxu1 %v2925_v18 }
 0x567   :  { %2587 = vmatpush3.bf16.msra.mxu1 %v2809_v19  ;;  %v2831_v19 = vld [vmem:[%s3587_s4 + $0x68] ss:$0 sps:$4 sm:$0x33]  }
 0x568   :  { %2604 = vmatprep.subr.bf16.mxu1 %v2925_v18 }
 0x62d   :  { %v1649_v20 = vpop.f32.mrb[36].mxu1 }
 0x62e   :  { %v1651_v21 = vpop.f32.mrb[37].mxu1 }
 0x62f   :  { %v1656_v22 = vmax.f32 %v1649_v20, %v1651_v21  ;;  %v1653_v23 = vpop.f32.mrb[38].mxu1  ;;  %v2116_v20 = vsel %vm2114_vm9, %v2831_v19, 0  ;;  %v73_v21 = vld [vmem:[%s3589_s6 + $0x3] ss:$0 sm:$0xff] }
 0x630   :  { %v1654_v24 = vpop.f32.mrb[39].mxu1 }
 0x631   :  { %1658 = vst.msk [vmem:[#allocation3] sm:$0xff] %vm1657_vm7, %v1656_v22 }
 0x638   :  { %v1669_v25 = vld [vmem:[#allocation3 + $0x2] sm:$0x3]  ;;  %v1814_v27 = vld [vmem:[#allocation3 + $0x4] sm:$0x3]  ;;  %v1659_v33 = vld [vmem:[#allocation3] sm:$0x3] }
 0x639   :  { %v1679_v28 = vpack.c.bf16 %v1669_v25, %v1669_v25  ;;  %v1824_v29 = vpack.c.bf16 %v1814_v27, %v1814_v27  ;;  %v1668_v35 = vpack.c.bf16 %v1659_v33, %v1659_v33  ;;  %v1893_v39 = vld [vmem:[#allocation3 + $0x6] sm:$0x3] }
 0x63a   :  { %v1903_v40 = vpack.c.bf16 %v1893_v39, %v1893_v39 }
 0x63b   :  { %2565 = vmatmul.mubr.msk.bf16.vlgmr.msra.gmra.mrb[20].mxu0 %vm1657_vm7, %v1679_v28  ;;  %2589 = vmatmul.mubr.msk.bf16.vlgmr.msra.gmra.mrb[40].mxu1 %vm1657_vm7, %v1824_v29 }
 0x63c   :  { %2569 = vmatpush3.bf16.msra.mxu0 %v2810_v26  ;;  %2576 = vmatprep.mubr.msk.bf16.mxu0 %vm2926_vm5, %v2925_v18 }
 0x63d   :  { %2570 = vmatprep.subr.bf16.mxu0 %v2925_v18  ;;  %2620 = vmatprep.mubr.msk.bf16.mxu1 %vm2926_vm5, %v2925_v18 }
 0x63e   :  { %2605 = vmatpush3.bf16.msra.mxu1 %v2818_v41 }
 0x63f   :  { %2606 = vmatprep.subr.bf16.mxu1 %v2925_v18 }
 0x640   :  { %2571 = vmatpush3.bf16.msra.mxu0 %v2811_v30 }
 0x641   :  { %2572 = vmatprep.subr.bf16.mxu0 %v2925_v18 }
 0x642   :  { %2607 = vmatpush3.bf16.msra.mxu1 %v2819_v42 }
 0x643   :  { %2608 = vmatprep.subr.bf16.mxu1 %v2925_v18 }
 0x644   :  { %2573 = vmatpush3.bf16.msra.mxu0 %v2812_v31 }
 0x645   :  { %2574 = vmatprep.subr.bf16.mxu0 %v2925_v18 }
 0x646   :  { %2609 = vmatpush3.bf16.msra.mxu1 %v2820_v43 }
 0x647   :  { %2610 = vmatprep.subr.bf16.mxu1 %v2925_v18 }
 0x648   :  { %2575 = vmatpush3.bf16.msra.mxu0 %v2813_v32  ;;  %v74_v32 = vld [vmem:[%s3589_s6 + $0x4] ss:$0 sm:$0xff]  ;;  %s2927_s6 = smov [#allocation4]  }
 0x649   :  { %2592 = vmatprep.subr.bf16.mxu0 %v2925_v18  ;;  %s2178_s8 = sshll.u32 %s2927_s6, 4  ;;  %s2179_s8 = int_to_ptr.vmem [resolvable:$true] %s2178_s8 }
 0x64a   :  { %2611 = vmatpush3.bf16.msra.mxu1 %v2821_v44  ;;  %s2900_s9 = scalar_lea.vmem %s2179_s8, 32  ;;  %p2905_p1 = scmp.lt.s32.totalorder %s2179_s8, %s2179_s8 }
 0x64b   :  { %2577 = vmatmul.mubr.msk.bf16.vlgmr.msra.gmra.mrb[24].mxu0 %vm1657_vm7, %v1668_v35  ;;  %2612 = vmatprep.subr.bf16.mxu1 %v2925_v18  ;;  %p2901_p0 = scmp.ne.s32.totalorder %s2179_s8, %s2900_s9  ;;  %p2906_p2 = scmp.lt.s32.totalorder %s2900_s9, %s2900_s9 }
 0x64c   :  { %2593 = vmatpush3.bf16.msra.mxu0 %v2814_v34  ;;  %2600 = vmatprep.mubr.msk.bf16.mxu0 %vm2926_vm5, %v2925_v18 }
 0x64d   :  { %2594 = vmatprep.subr.bf16.mxu0 %v2925_v18  ;;  %p2907_p3 = por %p2906_p2, %p2905_p1 }
 0x64e   :  { %2613 = vmatpush3.bf16.msra.mxu1 %v2822_v45 }
 0x64f   :  { %2614 = vmatprep.subr.bf16.mxu1 %v2925_v18  ;;  %p2908_p4 = pnand %p2907_p3, %p2901_p0 }
 0x650   :  { %2595 = vmatpush3.bf16.msra.mxu0 %v2815_v36 }
 0x651   :  { %2596 = vmatprep.subr.bf16.mxu0 %v2925_v18 }
 0x652   :  { %2615 = vmatpush3.bf16.msra.mxu1 %v2823_v46 }
 0x653   :  { %2616 = vmatprep.subr.bf16.mxu1 %v2925_v18 }
 0x654   :  { %2597 = vmatpush3.bf16.msra.mxu0 %v2816_v37 }
 0x655   :  { %2598 = vmatprep.subr.bf16.mxu0 %v2925_v18 }
 0x656   :  { %2617 = vmatpush3.bf16.msra.mxu1 %v2824_v47 }
 0x657   :  { %2618 = vmatprep.subr.bf16.mxu1 %v2925_v18 }
 0x658   :  { %2599 = vmatpush3.bf16.msra.mxu0 %v2817_v38 }
 0x659   :  { %2624 = vmatprep.subr.bf16.mxu0 %v2925_v18 }
 0x65a   :  { %2619 = vmatpush3.bf16.msra.mxu1 %v2029_v49 }
 0x65b   :  { %2601 = vmatmul.mubr.msk.bf16.vlgmr.msra.gmra.mrb[28].mxu0 %vm1657_vm7, %v1903_v40 }
 0x65c   :  { %2636 = vmatprep.mubr.msk.bf16.mxu0 %vm2926_vm5, %v2925_v18  ;;  %2625 = vmatpush3.bf16.msra.mxu0 %v2826_v2 }
 0x65d   :  { %2626 = vmatprep.subr.bf16.mxu0 %v2925_v18 }
 0x660   :  { %2627 = vmatpush3.bf16.msra.mxu0 %v2827_v14 }
 0x661   :  { %2628 = vmatprep.subr.bf16.mxu0 %v2925_v18 }
 0x664   :  { %2629 = vmatpush3.bf16.msra.mxu0 %v2828_v15 }
 0x665   :  { %2630 = vmatprep.subr.bf16.mxu0 %v2925_v18 }
 0x668   :  { %2631 = vmatpush3.bf16.msra.mxu0 %v2829_v16 }
 0x669   :  { %2632 = vmatprep.subr.bf16.mxu0 %v2925_v18 }
 0x66c   :  { %2633 = vmatpush3.bf16.msra.mxu0 %v2830_v17 }
 0x66d   :  { %2634 = vmatprep.subr.bf16.mxu0 %v2925_v18 }
 0x670   :  { %2635 = vmatpush3.bf16.msra.mxu0 %v2116_v20 }
 0x70e   :  { %v1741_v50 = vpop.f32.mrb[20].mxu0  ;;  %v1886_v51 = vpop.f32.mrb[40].mxu1 }
 0x70f   :  { %v2566_v52 = vpop.f32.mrb[21].mxu0  ;;  %v2590_v53 = vpop.f32.mrb[41].mxu1 }
 0x710   :  { %v1744_v54 = vpop.f32.mrb[22].mxu0  ;;  %v1889_v55 = vpop.f32.mrb[42].mxu1 }
 0x711   :  { %v2567_v56 = vpop.f32.mrb[23].mxu0  ;;  %v2591_v57 = vpop.f32.mrb[43].mxu1 }
 0x71e   :  { %v1808_v58 = vpop.f32.mrb[24].mxu0 }
 0x71f   :  { %v1809_v59 = vadd.f32 %v1808_v58, %v1741_v50  ;;  %v2578_v60 = vpop.f32.mrb[25].mxu0 }
 0x720   :  { %v1811_v61 = vpop.f32.mrb[26].mxu0 }
 0x721   :  { %v2579_v62 = vpop.f32.mrb[27].mxu0  ;;  %v1892_v63 = vadd.f32 %v1886_v51, %v1809_v59 }
 0x72e   :  { %v1965_v1 = vpop.f32.mrb[28].mxu0 }
 0x72f   :  { %v1971_v3 = vadd.f32 %v1965_v1, %v1892_v63  ;;  %v2602_v4 = vpop.f32.mrb[29].mxu0 }
 0x730   :  { %v1968_v5 = vpop.f32.mrb[30].mxu0 }
 0x731   :  { %v1972_v6 = vadd.f32 %v1971_v3, %v72_v0  ;;  %v2603_v7 = vpop.f32.mrb[31].mxu0 }
 0x733   :  { %v1973_v8 = vsub.f32 0.0, %v1972_v6 }
 0x735   :  { %v1974_v9 = vmul.f32 1.442695, %v1973_v8 }
 0x737   :  { %2888 = vpow2.f32 %v1974_v9 }
 0x741   :  { %v2889_v10 = vpop.eup %2888 }
 0x742   :  { %v1976_v11 = vadd.f32 1.0, %v2889_v10 }
 0x744   :  { %2890 = vrcp.f32 %v1976_v11 }
 0x74e   :  { %v2891_v12 = vpop.eup %2890 }
 0x74f   :  { %v1978_v13 = vpack.c.bf16 %v2891_v12, %v2891_v12 }
 0x751   :  { %2621 = vmatmul.mubr.msk.bf16.vlgmr.msra.gmra.mrb[44].mxu1 %vm2024_vm8, %v1978_v13 }
 0x824   :  { %v2065_v22 = vpop.f32.mrb[44].mxu1 }
 0x825   :  { %v2066_v23 = vadd.f32 %v2065_v22, %v73_v21  ;;  %v2622_v24 = vpop.f32.mrb[45].mxu1 }
 0x826   :  { %v2068_v25 = vpop.f32.mrb[46].mxu1 }
 0x827   :  { %v2071_v26 = vsub.f32 0.0, %v2066_v23  ;;  %v2623_v27 = vpop.f32.mrb[47].mxu1 }
 0x829   :  { %v2072_v28 = vmul.f32 1.442695, %v2071_v26 }
 0x82b   :  { %2892 = vpow2.f32 %v2072_v28 }
 0x835   :  { %v2893_v18 = vpop.eup %2892 }
 0x836   :  { %v2074_v29 = vadd.f32 1.0, %v2893_v18 }
 0x838   :  { %2894 = vrcp.f32 %v2074_v29 }
 0x842   :  { %v2895_v30 = vpop.eup %2894 }
 0x843   :  { %v2076_v31 = vpack.c.bf16 %v2895_v30, %v2895_v30 }
 0x845   :  { %2637 = vmatmul.mubr.msk.bf16.vlgmr.msra.gmra.mrb[32].mxu0 %vm2110_vm10, %v2076_v31 }
 0x918   :  { %v2152_v33 = vpop.f32.mrb[32].mxu0 }
 0x919   :  { %v2153_v34 = vadd.f32 %v2152_v33, %v74_v32  ;;  %v2638_v35 = vpop.f32.mrb[33].mxu0 }
 0x91a   :  { %v2155_v36 = vpop.f32.mrb[34].mxu0 }
 0x91b   :  { %v2639_v37 = vpop.f32.mrb[35].mxu0  ;;  %v2159_v38 = vsel %vm2158_vm11, %v2153_v34, -inf }
 0x91c   :  { %2160 = vmax.xlane.f32.xlu0 %v2159_v38 }
 0x9a9   :  { %v2161_v39 = vpop.xlane.xlu0 %2160 }
 0x9aa   :  { %v2162_v40 = vsub.f32 %v2153_v34, %v2161_v39 }
 0x9ac   :  { %v2163_v41 = vmul.f32 1.442695, %v2162_v40 }
 0x9ae   :  { %2896 = vpow2.f32 %v2163_v41 }
 0x9b8   :  { %v2897_v42 = vpop.eup %2896 }
 0x9b9   :  { %v2165_v43 = vsel %vm2158_vm11, %v2897_v42, 0.0 }
 0x9ba   :  { %2166 = vadd.xlane.f32.xlu0 %v2165_v43 }
 0xa47   :  { %v2167_v44 = vpop.xlane.xlu0 %2166 }
 0xa48   :  { %2898 = vlog2.f32 %v2167_v44 }
 0xa52   :  { %v2899_v45 = vpop.eup %2898 }
 0xa53   :  { %v2169_v46 = vmul.f32 0.6931472, %v2899_v45 }
 0xa55   :  { %v2170_v47 = vsub.f32 %v2162_v40, %v2169_v46 }
 0xa57   :  { %2171 = vst.msk [vmem:[#allocation4] sm:$0x3] %vm2158_vm11, %v2170_v47 }
 0xa58   :  { %2911 = shalt.err (!%p2908_p4)
}
 0xa59   :  { %s2912_s12 = scalar_lea.hbm %s3590_s7, 32 }
 0xa5a   :  { %p2913_p5 = scmp.ne.s32.totalorder %s3590_s7, %s2912_s12  ;;  %p2916_p6 = scmp.lt.u32.totalorder %s2912_s12, %s3590_s7 }
 0xa5c   :  { %p2918_p7 = pnand %p2916_p6, %p2913_p5 }
 0xa5e   :  { %2921 = shalt.err (!%p2918_p7)
}
 0xa5f   :  { %2181 = dma.vmem_to_hbm [thread:$0]  %s2179_s8, 32, %s3590_s7, [#allocation5]  }
 0xa60   :  { %2922 = dma.done.wait [#allocation5], 32  }
 0xa61   :  { %2923 = vsyncadd [#allocation5], 4294967264 }
 0xa62   :  { %2185 = vsyncpa [#allocation5], 1 }

</bundles_post_ra>
